<compile_context>
chip_gen: v5e
topology: v5e:2x2
jax: 0.10.0
libtpu: 0.0.40
codegen_flags: <defaults>
</compile_context>

<pallas_src>
import functools

import jax
import jax.numpy as jnp
from jax import lax
from jax.experimental import pallas as pl
from jax.experimental.pallas import tpu as pltpu


def _round_up(n, m):
    return ((n + m - 1) // m) * m


def _lstm_skip_kernel(xproj_ref, xskip_ref, whh_ref,
                      out_ref, hn_ref, cn_ref,
                      h_sc, c_sc):
    """One grid step == CHUNK_T time steps.

    xproj_ref : (CHUNK_T, B, 4*HP) precomputed x @ W_ih^T + b  (gate-lane padded)
    xskip_ref : (CHUNK_T, B, HP)   lane-padded input, for the fused skip add
    whh_ref   : (HP, 4*HP)         lane-padded recurrent weight (transposed)
    h_sc/c_sc : (B, HP)            recurrent state, persists across grid steps
    """
    ci = pl.program_id(0)

    @pl.when(ci == 0)
    def _():
        h_sc[...] = jnp.zeros_like(h_sc)
        c_sc[...] = jnp.zeros_like(c_sc)

    chunk_t = xproj_ref.shape[0]
    hp = h_sc.shape[-1]                       # lane-padded hidden (multiple of 128)

    def step(t, carry):
        h, c = carry
        # (B, 4*HP); every gate block starts on a 128-lane boundary.
        gates = xproj_ref[t] + jnp.dot(h, whh_ref[...],
                                       preferred_element_type=jnp.float32)
        i_g = jax.nn.sigmoid(gates[:, 0 * hp:1 * hp])
        f_g = jax.nn.sigmoid(gates[:, 1 * hp:2 * hp])
        g_g = jnp.tanh(gates[:, 2 * hp:3 * hp])
        o_g = jax.nn.sigmoid(gates[:, 3 * hp:4 * hp])
        c_new = f_g * c + i_g * g_g
        h_new = o_g * jnp.tanh(c_new)
        # Fused skip connection; lane-dense (HP-wide) store.
        out_ref[t] = (h_new + xskip_ref[t]).astype(out_ref.dtype)
        return (h_new, c_new)

    h_f, c_f = lax.fori_loop(0, chunk_t, step, (h_sc[...], c_sc[...]),
                             unroll=True)
    h_sc[...] = h_f
    c_sc[...] = c_f
    # Written every chunk (constant output block index) so the buffers are never
    # returned uninitialized; the last chunk's value is what lands in HBM.
    hn_ref[0] = h_f.astype(hn_ref.dtype)
    cn_ref[0] = c_f.astype(cn_ref.dtype)


@functools.partial(jax.jit, static_argnames=("chunk_t",))
def skip_connection_lstm(x, w_ih, w_hh, b_ih, b_hh, *, chunk_t=None):
    """x: (T, B, D) f32.  w_ih/w_hh: (4H, D)/(4H, H), PyTorch gate order [i,f,g,o].
    Returns (out, (h_n, c_n)) for a single-layer unidirectional LSTM with H == D
    and the skip connection out = lstm(x) + x fused into the kernel."""
    T, B, D = x.shape
    H = w_hh.shape[1]
    assert w_ih.shape == (4 * H, D) and w_hh.shape == (4 * H, H)
    assert H == D, "skip add requires hidden_size == input_size (unidirectional)"
    if chunk_t is None:
        chunk_t = T
    assert T % chunk_t == 0

    f32 = jnp.float32
    hp = _round_up(H, 128)          # lane-padded hidden width
    pad = hp - H

    # ---- lane-pad weights so each gate's columns start on a 128-lane boundary ----
    # W_ih: (4H, D) -> (D, 4*HP)
    wih_g = jnp.pad(w_ih.astype(f32).reshape(4, H, D), ((0, 0), (0, pad), (0, 0)))
    wih_t_pad = jnp.transpose(wih_g, (2, 0, 1)).reshape(D, 4 * hp)
    # W_hh: (4H, H) -> (HP, 4*HP); padded h rows and padded gate columns are zero,
    # so padded state lanes stay exactly 0 through the recurrence.
    whh_g = jnp.pad(w_hh.astype(f32).reshape(4, H, H), ((0, 0), (0, pad), (0, pad)))
    whh_t_pad = jnp.transpose(whh_g, (2, 0, 1)).reshape(hp, 4 * hp)
    # Fused bias, zero in padded lanes.
    b_pad = jnp.pad((b_ih + b_hh).astype(f32).reshape(4, H),
                    ((0, 0), (0, pad))).reshape(4 * hp)

    # ---- hoisted input projection: ONE (T*B, D) @ (D, 4*HP) matmul (no seq dep) ----
    xproj = (jnp.dot(x.astype(f32).reshape(T * B, D), wih_t_pad) + b_pad
             ).reshape(T, B, 4 * hp)

    # ---- lane-padded input for the fused skip add ----
    x_pad = jnp.pad(x.astype(f32), ((0, 0), (0, 0), (0, pad)))

    out_pad, hn_pad, cn_pad = pl.pallas_call(
        _lstm_skip_kernel,
        out_shape=(
            jax.ShapeDtypeStruct((T, B, hp), f32),   # out (with skip), lane-padded
            jax.ShapeDtypeStruct((1, B, hp), f32),   # h_n, lane-padded
            jax.ShapeDtypeStruct((1, B, hp), f32),   # c_n, lane-padded
        ),
        grid_spec=pltpu.PrefetchScalarGridSpec(
            num_scalar_prefetch=0,
            grid=(T // chunk_t,),
            in_specs=[
                pl.BlockSpec((chunk_t, B, 4 * hp), lambda c: (c, 0, 0)),   # x_proj
                pl.BlockSpec((chunk_t, B, hp), lambda c: (c, 0, 0)),       # x (skip)
                pl.BlockSpec((hp, 4 * hp), lambda c: (0, 0)),              # W_hh^T
            ],
            out_specs=[
                pl.BlockSpec((chunk_t, B, hp), lambda c: (c, 0, 0)),
                pl.BlockSpec((1, B, hp), lambda c: (0, 0, 0)),
                pl.BlockSpec((1, B, hp), lambda c: (0, 0, 0)),
            ],
            scratch_shapes=[
                pltpu.VMEM((B, hp), f32),   # h state
                pltpu.VMEM((B, hp), f32),   # c state
            ],
        ),
        compiler_params=pltpu.CompilerParams(
            dimension_semantics=("arbitrary",)),   # sequential recurrence over chunks
    )(xproj, x_pad, whh_t_pad)

    out = out_pad[..., :H].astype(x.dtype)
    h_n = hn_pad[..., :H].astype(x.dtype)
    c_n = cn_pad[..., :H].astype(x.dtype)
    return out, (h_n, c_n)


def _reference(x, w_ih, w_hh, b_ih, b_hh):
    """Pure-JAX reference (mirrors torch.nn.LSTM + skip)."""
    T, B, D = x.shape
    H = w_hh.shape[1]
    b = b_ih + b_hh

    def step(carry, x_t):
        h, c = carry
        gates = x_t @ w_ih.T + h @ w_hh.T + b
        i = jax.nn.sigmoid(gates[:, 0 * H:1 * H])
        f = jax.nn.sigmoid(gates[:, 1 * H:2 * H])
        g = jnp.tanh(gates[:, 2 * H:3 * H])
        o = jax.nn.sigmoid(gates[:, 3 * H:4 * H])
        c_new = f * c + i * g
        h_new = o * jnp.tanh(c_new)
        return (h_new, c_new), h_new

    (h_n, c_n), hs = lax.scan(step,
                              (jnp.zeros((B, H), x.dtype),
                               jnp.zeros((B, H), x.dtype)),
                              x)
    out = hs + x
    return out, (h_n[None], c_n[None])


if __name__ == "__main__":
    key = jax.random.PRNGKey(0)
    T, B, D = 8, 2, 32          # seq=8, batch=2, input=hidden=32
    H = D

    k_x, k_wih, k_whh, k_bih, k_bhh = jax.random.split(key, 5)
    scale = 1.0 / jnp.sqrt(H)
    x = jax.random.normal(k_x, (T, B, D), jnp.float32)
    w_ih = jax.random.uniform(k_wih, (4 * H, D), jnp.float32, -scale, scale)
    w_hh = jax.random.uniform(k_whh, (4 * H, H), jnp.float32, -scale, scale)
    b_ih = jax.random.uniform(k_bih, (4 * H,), jnp.float32, -scale, scale)
    b_hh = jax.random.uniform(k_bhh, (4 * H,), jnp.float32, -scale, scale)

    out, (h_n, c_n) = skip_connection_lstm(x, w_ih, w_hh, b_ih, b_hh)
    jax.block_until_ready((out, h_n, c_n))

    out_ref, (h_ref, c_ref) = _reference(x, w_ih, w_hh, b_ih, b_hh)
    # Tolerance allows for XLA-vs-Mosaic f32 matmul rounding differences.
    assert jnp.allclose(out, out_ref, atol=1e-4, rtol=1e-4)
    assert jnp.allclose(h_n, h_ref, atol=1e-4, rtol=1e-4)
    assert jnp.allclose(c_n, c_ref, atol=1e-4, rtol=1e-4)

    print("KERNEL_OK")
</pallas_src>

<mosaic_0001>
module attributes {stable_mosaic.version = 11 : i64} {
  func.func @_lstm_skip_kernel(%arg0: i32, %arg1: memref<8x2x512xf32, #tpu.memory_space<vmem>>, %arg2: memref<8x2x128xf32, #tpu.memory_space<vmem>>, %arg3: memref<128x512xf32, #tpu.memory_space<vmem>>, %arg4: memref<8x2x128xf32, #tpu.memory_space<vmem>>, %arg5: memref<1x2x128xf32, #tpu.memory_space<vmem>>, %arg6: memref<1x2x128xf32, #tpu.memory_space<vmem>>, %arg7: memref<2x128xf32, #tpu.memory_space<vmem>>, %arg8: memref<2x128xf32, #tpu.memory_space<vmem>>) attributes {dimension_semantics = [#tpu.dimension_semantics<arbitrary>], iteration_bounds = array<i64: 1>, scalar_prefetch = 0 : i64, scratch_operands = 2 : i64, tpu.core_type = #tpu.core_type<tc>, window_params = [{transform_indices = @transform_0, window_bounds = array<i64: 8, 2, 512>}, {transform_indices = @transform_1, window_bounds = array<i64: 8, 2, 128>}, {pipeline_mode = #tpu.pipeline_mode<synchronous>, transform_indices = @transform_2, window_bounds = array<i64: 128, 512>}, {transform_indices = @transform_3, window_bounds = array<i64: 8, 2, 128>}, {pipeline_mode = #tpu.pipeline_mode<synchronous>, transform_indices = @transform_4, window_bounds = array<i64: 1, 2, 128>}, {pipeline_mode = #tpu.pipeline_mode<synchronous>, transform_indices = @transform_5, window_bounds = array<i64: 1, 2, 128>}]} {
    %c0_i32 = arith.constant 0 : i32
    %0 = arith.cmpi eq, %arg0, %c0_i32 : i32
    %1 = arith.extui %0 : i1 to i32
    %c0_i32_0 = arith.constant 0 : i32
    %2 = arith.cmpi ne, %1, %c0_i32_0 : i32
    scf.if %2 {
      %cst_110 = arith.constant 0.000000e+00 : f32
      %325 = vector.broadcast %cst_110 : f32 to vector<2x128xf32>
      %c0_111 = arith.constant 0 : index
      %c0_112 = arith.constant 0 : index
      %326 = vector.load %arg7[%c0_111, %c0_112] : memref<2x128xf32, #tpu.memory_space<vmem>>, vector<2x128xf32>
      tpu.vector_store %arg7[%c0_111, %c0_112], %325 {strides = array<i32>} : memref<2x128xf32, #tpu.memory_space<vmem>>, vector<2x128xf32>,
      %cst_113 = arith.constant 0.000000e+00 : f32
      %327 = vector.broadcast %cst_113 : f32 to vector<2x128xf32>
      %c0_114 = arith.constant 0 : index
      %c0_115 = arith.constant 0 : index
      %328 = vector.load %arg8[%c0_114, %c0_115] : memref<2x128xf32, #tpu.memory_space<vmem>>, vector<2x128xf32>
      tpu.vector_store %arg8[%c0_114, %c0_115], %327 {strides = array<i32>} : memref<2x128xf32, #tpu.memory_space<vmem>>, vector<2x128xf32>,
    } else {
    }
    %c0 = arith.constant 0 : index
    %c0_1 = arith.constant 0 : index
    %3 = vector.load %arg7[%c0, %c0_1] : memref<2x128xf32, #tpu.memory_space<vmem>>, vector<2x128xf32>
    %c0_2 = arith.constant 0 : index
    %c0_3 = arith.constant 0 : index
    %4 = vector.load %arg8[%c0_2, %c0_3] : memref<2x128xf32, #tpu.memory_space<vmem>>, vector<2x128xf32>
    %c0_i32_4 = arith.constant 0 : i32
    %5 = arith.index_cast %c0_i32_4 : i32 to index
    %c0_5 = arith.constant 0 : index
    %c0_6 = arith.constant 0 : index
    %6 = vector.load %arg1[%5, %c0_5, %c0_6] : memref<8x2x512xf32, #tpu.memory_space<vmem>>, vector<1x2x512xf32>
    %7 = vector.shape_cast %6 : vector<1x2x512xf32> to vector<2x512xf32>
    %c0_7 = arith.constant 0 : index
    %c0_8 = arith.constant 0 : index
    %8 = vector.load %arg3[%c0_7, %c0_8] : memref<128x512xf32, #tpu.memory_space<vmem>>, vector<128x512xf32>
    %cst = arith.constant dense<0.000000e+00> : vector<2x512xf32>
    %9 = tpu.matmul %3, %8, %cst {dimension_numbers = #tpu.dot_dimension_numbers<[1], [0], [0], [1], [0, 0, 1, 1], [], []>} : vector<2x128xf32>, vector<128x512xf32>, vector<2x512xf32> -> vector<2x512xf32>
    %10 = arith.addf %7, %9 : vector<2x512xf32>
    %11 = vector.extract_strided_slice %10 {offsets = [0, 0], sizes = [2, 128], strides = [1, 1]} : vector<2x512xf32> to vector<2x128xf32>
    %12 = arith.negf %11 : vector<2x128xf32>
    %13 = math.exp %12 : vector<2x128xf32>
    %cst_9 = arith.constant 1.000000e+00 : f32
    %14 = vector.broadcast %cst_9 : f32 to vector<2x128xf32>
    %15 = arith.addf %14, %13 : vector<2x128xf32>
    %16 = arith.divf %14, %15 : vector<2x128xf32>
    %17 = vector.extract_strided_slice %10 {offsets = [0, 128], sizes = [2, 128], strides = [1, 1]} : vector<2x512xf32> to vector<2x128xf32>
    %18 = arith.negf %17 : vector<2x128xf32>
    %19 = math.exp %18 : vector<2x128xf32>
    %cst_10 = arith.constant 1.000000e+00 : f32
    %20 = vector.broadcast %cst_10 : f32 to vector<2x128xf32>
    %21 = arith.addf %20, %19 : vector<2x128xf32>
    %22 = arith.divf %20, %21 : vector<2x128xf32>
    %23 = vector.extract_strided_slice %10 {offsets = [0, 256], sizes = [2, 128], strides = [1, 1]} : vector<2x512xf32> to vector<2x128xf32>
    %24 = math.tanh %23 : vector<2x128xf32>
    %25 = vector.extract_strided_slice %10 {offsets = [0, 384], sizes = [2, 128], strides = [1, 1]} : vector<2x512xf32> to vector<2x128xf32>
    %26 = arith.negf %25 : vector<2x128xf32>
    %27 = math.exp %26 : vector<2x128xf32>
    %cst_11 = arith.constant 1.000000e+00 : f32
    %28 = vector.broadcast %cst_11 : f32 to vector<2x128xf32>
    %29 = arith.addf %28, %27 : vector<2x128xf32>
    %30 = arith.divf %28, %29 : vector<2x128xf32>
    %31 = arith.mulf %22, %4 : vector<2x128xf32>
    %32 = arith.mulf %16, %24 : vector<2x128xf32>
    %33 = arith.addf %31, %32 : vector<2x128xf32>
    %34 = math.tanh %33 : vector<2x128xf32>
    %35 = arith.mulf %30, %34 : vector<2x128xf32>
    %36 = arith.index_cast %c0_i32_4 : i32 to index
    %c0_12 = arith.constant 0 : index
    %c0_13 = arith.constant 0 : index
    %37 = vector.load %arg2[%36, %c0_12, %c0_13] : memref<8x2x128xf32, #tpu.memory_space<vmem>>, vector<1x2x128xf32>
    %38 = vector.shape_cast %37 : vector<1x2x128xf32> to vector<2x128xf32>
    %39 = arith.addf %35, %38 : vector<2x128xf32>
    %40 = arith.index_cast %c0_i32_4 : i32 to index
    %c0_14 = arith.constant 0 : index
    %c0_15 = arith.constant 0 : index
    %41 = vector.load %arg4[%40, %c0_14, %c0_15] : memref<8x2x128xf32, #tpu.memory_space<vmem>>, vector<1x2x128xf32>
    %42 = vector.shape_cast %41 : vector<1x2x128xf32> to vector<2x128xf32>
    %43 = vector.shape_cast %39 : vector<2x128xf32> to vector<1x2x128xf32>
    tpu.vector_store %arg4[%40, %c0_14, %c0_15], %43 {strides = array<i32>} : memref<8x2x128xf32, #tpu.memory_space<vmem>>, vector<1x2x128xf32>,
    %c1_i32 = arith.constant 1 : i32
    %44 = arith.index_cast %c1_i32 : i32 to index
    %c0_16 = arith.constant 0 : index
    %c0_17 = arith.constant 0 : index
    %45 = vector.load %arg1[%44, %c0_16, %c0_17] : memref<8x2x512xf32, #tpu.memory_space<vmem>>, vector<1x2x512xf32>
    %46 = vector.shape_cast %45 : vector<1x2x512xf32> to vector<2x512xf32>
    %c0_18 = arith.constant 0 : index
    %c0_19 = arith.constant 0 : index
    %47 = vector.load %arg3[%c0_18, %c0_19] : memref<128x512xf32, #tpu.memory_space<vmem>>, vector<128x512xf32>
    %cst_20 = arith.constant dense<0.000000e+00> : vector<2x512xf32>
    %48 = tpu.matmul %35, %47, %cst_20 {dimension_numbers = #tpu.dot_dimension_numbers<[1], [0], [0], [1], [0, 0, 1, 1], [], []>} : vector<2x128xf32>, vector<128x512xf32>, vector<2x512xf32> -> vector<2x512xf32>
    %49 = arith.addf %46, %48 : vector<2x512xf32>
    %50 = vector.extract_strided_slice %49 {offsets = [0, 0], sizes = [2, 128], strides = [1, 1]} : vector<2x512xf32> to vector<2x128xf32>
    %51 = arith.negf %50 : vector<2x128xf32>
    %52 = math.exp %51 : vector<2x128xf32>
    %cst_21 = arith.constant 1.000000e+00 : f32
    %53 = vector.broadcast %cst_21 : f32 to vector<2x128xf32>
    %54 = arith.addf %53, %52 : vector<2x128xf32>
    %55 = arith.divf %53, %54 : vector<2x128xf32>
    %56 = vector.extract_strided_slice %49 {offsets = [0, 128], sizes = [2, 128], strides = [1, 1]} : vector<2x512xf32> to vector<2x128xf32>
    %57 = arith.negf %56 : vector<2x128xf32>
    %58 = math.exp %57 : vector<2x128xf32>
    %cst_22 = arith.constant 1.000000e+00 : f32
    %59 = vector.broadcast %cst_22 : f32 to vector<2x128xf32>
    %60 = arith.addf %59, %58 : vector<2x128xf32>
    %61 = arith.divf %59, %60 : vector<2x128xf32>
    %62 = vector.extract_strided_slice %49 {offsets = [0, 256], sizes = [2, 128], strides = [1, 1]} : vector<2x512xf32> to vector<2x128xf32>
    %63 = math.tanh %62 : vector<2x128xf32>
    %64 = vector.extract_strided_slice %49 {offsets = [0, 384], sizes = [2, 128], strides = [1, 1]} : vector<2x512xf32> to vector<2x128xf32>
    %65 = arith.negf %64 : vector<2x128xf32>
    %66 = math.exp %65 : vector<2x128xf32>
    %cst_23 = arith.constant 1.000000e+00 : f32
    %67 = vector.broadcast %cst_23 : f32 to vector<2x128xf32>
    %68 = arith.addf %67, %66 : vector<2x128xf32>
    %69 = arith.divf %67, %68 : vector<2x128xf32>
    %70 = arith.mulf %61, %33 : vector<2x128xf32>
    %71 = arith.mulf %55, %63 : vector<2x128xf32>
    %72 = arith.addf %70, %71 : vector<2x128xf32>
    %73 = math.tanh %72 : vector<2x128xf32>
    %74 = arith.mulf %69, %73 : vector<2x128xf32>
    %75 = arith.index_cast %c1_i32 : i32 to index
    %c0_24 = arith.constant 0 : index
    %c0_25 = arith.constant 0 : index
    %76 = vector.load %arg2[%75, %c0_24, %c0_25] : memref<8x2x128xf32, #tpu.memory_space<vmem>>, vector<1x2x128xf32>
    %77 = vector.shape_cast %76 : vector<1x2x128xf32> to vector<2x128xf32>
    %78 = arith.addf %74, %77 : vector<2x128xf32>
    %79 = arith.index_cast %c1_i32 : i32 to index
    %c0_26 = arith.constant 0 : index
    %c0_27 = arith.constant 0 : index
    %80 = vector.load %arg4[%79, %c0_26, %c0_27] : memref<8x2x128xf32, #tpu.memory_space<vmem>>, vector<1x2x128xf32>
    %81 = vector.shape_cast %80 : vector<1x2x128xf32> to vector<2x128xf32>
    %82 = vector.shape_cast %78 : vector<2x128xf32> to vector<1x2x128xf32>
    tpu.vector_store %arg4[%79, %c0_26, %c0_27], %82 {strides = array<i32>} : memref<8x2x128xf32, #tpu.memory_space<vmem>>, vector<1x2x128xf32>,
    %c2_i32 = arith.constant 2 : i32
    %83 = arith.index_cast %c2_i32 : i32 to index
    %c0_28 = arith.constant 0 : index
    %c0_29 = arith.constant 0 : index
    %84 = vector.load %arg1[%83, %c0_28, %c0_29] : memref<8x2x512xf32, #tpu.memory_space<vmem>>, vector<1x2x512xf32>
    %85 = vector.shape_cast %84 : vector<1x2x512xf32> to vector<2x512xf32>
    %c0_30 = arith.constant 0 : index
    %c0_31 = arith.constant 0 : index
    %86 = vector.load %arg3[%c0_30, %c0_31] : memref<128x512xf32, #tpu.memory_space<vmem>>, vector<128x512xf32>
    %cst_32 = arith.constant dense<0.000000e+00> : vector<2x512xf32>
    %87 = tpu.matmul %74, %86, %cst_32 {dimension_numbers = #tpu.dot_dimension_numbers<[1], [0], [0], [1], [0, 0, 1, 1], [], []>} : vector<2x128xf32>, vector<128x512xf32>, vector<2x512xf32> -> vector<2x512xf32>
    %88 = arith.addf %85, %87 : vector<2x512xf32>
    %89 = vector.extract_strided_slice %88 {offsets = [0, 0], sizes = [2, 128], strides = [1, 1]} : vector<2x512xf32> to vector<2x128xf32>
    %90 = arith.negf %89 : vector<2x128xf32>
    %91 = math.exp %90 : vector<2x128xf32>
    %cst_33 = arith.constant 1.000000e+00 : f32
    %92 = vector.broadcast %cst_33 : f32 to vector<2x128xf32>
    %93 = arith.addf %92, %91 : vector<2x128xf32>
    %94 = arith.divf %92, %93 : vector<2x128xf32>
    %95 = vector.extract_strided_slice %88 {offsets = [0, 128], sizes = [2, 128], strides = [1, 1]} : vector<2x512xf32> to vector<2x128xf32>
    %96 = arith.negf %95 : vector<2x128xf32>
    %97 = math.exp %96 : vector<2x128xf32>
    %cst_34 = arith.constant 1.000000e+00 : f32
    %98 = vector.broadcast %cst_34 : f32 to vector<2x128xf32>
    %99 = arith.addf %98, %97 : vector<2x128xf32>
    %100 = arith.divf %98, %99 : vector<2x128xf32>
    %101 = vector.extract_strided_slice %88 {offsets = [0, 256], sizes = [2, 128], strides = [1, 1]} : vector<2x512xf32> to vector<2x128xf32>
    %102 = math.tanh %101 : vector<2x128xf32>
    %103 = vector.extract_strided_slice %88 {offsets = [0, 384], sizes = [2, 128], strides = [1, 1]} : vector<2x512xf32> to vector<2x128xf32>
    %104 = arith.negf %103 : vector<2x128xf32>
    %105 = math.exp %104 : vector<2x128xf32>
    %cst_35 = arith.constant 1.000000e+00 : f32
    %106 = vector.broadcast %cst_35 : f32 to vector<2x128xf32>
    %107 = arith.addf %106, %105 : vector<2x128xf32>
    %108 = arith.divf %106, %107 : vector<2x128xf32>
    %109 = arith.mulf %100, %72 : vector<2x128xf32>
    %110 = arith.mulf %94, %102 : vector<2x128xf32>
    %111 = arith.addf %109, %110 : vector<2x128xf32>
    %112 = math.tanh %111 : vector<2x128xf32>
    %113 = arith.mulf %108, %112 : vector<2x128xf32>
    %114 = arith.index_cast %c2_i32 : i32 to index
    %c0_36 = arith.constant 0 : index
    %c0_37 = arith.constant 0 : index
    %115 = vector.load %arg2[%114, %c0_36, %c0_37] : memref<8x2x128xf32, #tpu.memory_space<vmem>>, vector<1x2x128xf32>
    %116 = vector.shape_cast %115 : vector<1x2x128xf32> to vector<2x128xf32>
    %117 = arith.addf %113, %116 : vector<2x128xf32>
    %118 = arith.index_cast %c2_i32 : i32 to index
    %c0_38 = arith.constant 0 : index
    %c0_39 = arith.constant 0 : index
    %119 = vector.load %arg4[%118, %c0_38, %c0_39] : memref<8x2x128xf32, #tpu.memory_space<vmem>>, vector<1x2x128xf32>
    %120 = vector.shape_cast %119 : vector<1x2x128xf32> to vector<2x128xf32>
    %121 = vector.shape_cast %117 : vector<2x128xf32> to vector<1x2x128xf32>
    tpu.vector_store %arg4[%118, %c0_38, %c0_39], %121 {strides = array<i32>} : memref<8x2x128xf32, #tpu.memory_space<vmem>>, vector<1x2x128xf32>,
    %c3_i32 = arith.constant 3 : i32
    %122 = arith.index_cast %c3_i32 : i32 to index
    %c0_40 = arith.constant 0 : index
    %c0_41 = arith.constant 0 : index
    %123 = vector.load %arg1[%122, %c0_40, %c0_41] : memref<8x2x512xf32, #tpu.memory_space<vmem>>, vector<1x2x512xf32>
    %124 = vector.shape_cast %123 : vector<1x2x512xf32> to vector<2x512xf32>
    %c0_42 = arith.constant 0 : index
    %c0_43 = arith.constant 0 : index
    %125 = vector.load %arg3[%c0_42, %c0_43] : memref<128x512xf32, #tpu.memory_space<vmem>>, vector<128x512xf32>
    %cst_44 = arith.constant dense<0.000000e+00> : vector<2x512xf32>
    %126 = tpu.matmul %113, %125, %cst_44 {dimension_numbers = #tpu.dot_dimension_numbers<[1], [0], [0], [1], [0, 0, 1, 1], [], []>} : vector<2x128xf32>, vector<128x512xf32>, vector<2x512xf32> -> vector<2x512xf32>
    %127 = arith.addf %124, %126 : vector<2x512xf32>
    %128 = vector.extract_strided_slice %127 {offsets = [0, 0], sizes = [2, 128], strides = [1, 1]} : vector<2x512xf32> to vector<2x128xf32>
    %129 = arith.negf %128 : vector<2x128xf32>
    %130 = math.exp %129 : vector<2x128xf32>
    %cst_45 = arith.constant 1.000000e+00 : f32
    %131 = vector.broadcast %cst_45 : f32 to vector<2x128xf32>
    %132 = arith.addf %131, %130 : vector<2x128xf32>
    %133 = arith.divf %131, %132 : vector<2x128xf32>
    %134 = vector.extract_strided_slice %127 {offsets = [0, 128], sizes = [2, 128], strides = [1, 1]} : vector<2x512xf32> to vector<2x128xf32>
    %135 = arith.negf %134 : vector<2x128xf32>
    %136 = math.exp %135 : vector<2x128xf32>
    %cst_46 = arith.constant 1.000000e+00 : f32
    %137 = vector.broadcast %cst_46 : f32 to vector<2x128xf32>
    %138 = arith.addf %137, %136 : vector<2x128xf32>
    %139 = arith.divf %137, %138 : vector<2x128xf32>
    %140 = vector.extract_strided_slice %127 {offsets = [0, 256], sizes = [2, 128], strides = [1, 1]} : vector<2x512xf32> to vector<2x128xf32>
    %141 = math.tanh %140 : vector<2x128xf32>
    %142 = vector.extract_strided_slice %127 {offsets = [0, 384], sizes = [2, 128], strides = [1, 1]} : vector<2x512xf32> to vector<2x128xf32>
    %143 = arith.negf %142 : vector<2x128xf32>
    %144 = math.exp %143 : vector<2x128xf32>
    %cst_47 = arith.constant 1.000000e+00 : f32
    %145 = vector.broadcast %cst_47 : f32 to vector<2x128xf32>
    %146 = arith.addf %145, %144 : vector<2x128xf32>
    %147 = arith.divf %145, %146 : vector<2x128xf32>
    %148 = arith.mulf %139, %111 : vector<2x128xf32>
    %149 = arith.mulf %133, %141 : vector<2x128xf32>
    %150 = arith.addf %148, %149 : vector<2x128xf32>
    %151 = math.tanh %150 : vector<2x128xf32>
    %152 = arith.mulf %147, %151 : vector<2x128xf32>
    %153 = arith.index_cast %c3_i32 : i32 to index
    %c0_48 = arith.constant 0 : index
    %c0_49 = arith.constant 0 : index
    %154 = vector.load %arg2[%153, %c0_48, %c0_49] : memref<8x2x128xf32, #tpu.memory_space<vmem>>, vector<1x2x128xf32>
    %155 = vector.shape_cast %154 : vector<1x2x128xf32> to vector<2x128xf32>
    %156 = arith.addf %152, %155 : vector<2x128xf32>
    %157 = arith.index_cast %c3_i32 : i32 to index
    %c0_50 = arith.constant 0 : index
    %c0_51 = arith.constant 0 : index
    %158 = vector.load %arg4[%157, %c0_50, %c0_51] : memref<8x2x128xf32, #tpu.memory_space<vmem>>, vector<1x2x128xf32>
    %159 = vector.shape_cast %158 : vector<1x2x128xf32> to vector<2x128xf32>
    %160 = vector.shape_cast %156 : vector<2x128xf32> to vector<1x2x128xf32>
    tpu.vector_store %arg4[%157, %c0_50, %c0_51], %160 {strides = array<i32>} : memref<8x2x128xf32, #tpu.memory_space<vmem>>, vector<1x2x128xf32>,
    %c4_i32 = arith.constant 4 : i32
    %161 = arith.index_cast %c4_i32 : i32 to index
    %c0_52 = arith.constant 0 : index
    %c0_53 = arith.constant 0 : index
    %162 = vector.load %arg1[%161, %c0_52, %c0_53] : memref<8x2x512xf32, #tpu.memory_space<vmem>>, vector<1x2x512xf32>
    %163 = vector.shape_cast %162 : vector<1x2x512xf32> to vector<2x512xf32>
    %c0_54 = arith.constant 0 : index
    %c0_55 = arith.constant 0 : index
    %164 = vector.load %arg3[%c0_54, %c0_55] : memref<128x512xf32, #tpu.memory_space<vmem>>, vector<128x512xf32>
    %cst_56 = arith.constant dense<0.000000e+00> : vector<2x512xf32>
    %165 = tpu.matmul %152, %164, %cst_56 {dimension_numbers = #tpu.dot_dimension_numbers<[1], [0], [0], [1], [0, 0, 1, 1], [], []>} : vector<2x128xf32>, vector<128x512xf32>, vector<2x512xf32> -> vector<2x512xf32>
    %166 = arith.addf %163, %165 : vector<2x512xf32>
    %167 = vector.extract_strided_slice %166 {offsets = [0, 0], sizes = [2, 128], strides = [1, 1]} : vector<2x512xf32> to vector<2x128xf32>
    %168 = arith.negf %167 : vector<2x128xf32>
    %169 = math.exp %168 : vector<2x128xf32>
    %cst_57 = arith.constant 1.000000e+00 : f32
    %170 = vector.broadcast %cst_57 : f32 to vector<2x128xf32>
    %171 = arith.addf %170, %169 : vector<2x128xf32>
    %172 = arith.divf %170, %171 : vector<2x128xf32>
    %173 = vector.extract_strided_slice %166 {offsets = [0, 128], sizes = [2, 128], strides = [1, 1]} : vector<2x512xf32> to vector<2x128xf32>
    %174 = arith.negf %173 : vector<2x128xf32>
    %175 = math.exp %174 : vector<2x128xf32>
    %cst_58 = arith.constant 1.000000e+00 : f32
    %176 = vector.broadcast %cst_58 : f32 to vector<2x128xf32>
    %177 = arith.addf %176, %175 : vector<2x128xf32>
    %178 = arith.divf %176, %177 : vector<2x128xf32>
    %179 = vector.extract_strided_slice %166 {offsets = [0, 256], sizes = [2, 128], strides = [1, 1]} : vector<2x512xf32> to vector<2x128xf32>
    %180 = math.tanh %179 : vector<2x128xf32>
    %181 = vector.extract_strided_slice %166 {offsets = [0, 384], sizes = [2, 128], strides = [1, 1]} : vector<2x512xf32> to vector<2x128xf32>
    %182 = arith.negf %181 : vector<2x128xf32>
    %183 = math.exp %182 : vector<2x128xf32>
    %cst_59 = arith.constant 1.000000e+00 : f32
    %184 = vector.broadcast %cst_59 : f32 to vector<2x128xf32>
    %185 = arith.addf %184, %183 : vector<2x128xf32>
    %186 = arith.divf %184, %185 : vector<2x128xf32>
    %187 = arith.mulf %178, %150 : vector<2x128xf32>
    %188 = arith.mulf %172, %180 : vector<2x128xf32>
    %189 = arith.addf %187, %188 : vector<2x128xf32>
    %190 = math.tanh %189 : vector<2x128xf32>
    %191 = arith.mulf %186, %190 : vector<2x128xf32>
    %192 = arith.index_cast %c4_i32 : i32 to index
    %c0_60 = arith.constant 0 : index
    %c0_61 = arith.constant 0 : index
    %193 = vector.load %arg2[%192, %c0_60, %c0_61] : memref<8x2x128xf32, #tpu.memory_space<vmem>>, vector<1x2x128xf32>
    %194 = vector.shape_cast %193 : vector<1x2x128xf32> to vector<2x128xf32>
    %195 = arith.addf %191, %194 : vector<2x128xf32>
    %196 = arith.index_cast %c4_i32 : i32 to index
    %c0_62 = arith.constant 0 : index
    %c0_63 = arith.constant 0 : index
    %197 = vector.load %arg4[%196, %c0_62, %c0_63] : memref<8x2x128xf32, #tpu.memory_space<vmem>>, vector<1x2x128xf32>
    %198 = vector.shape_cast %197 : vector<1x2x128xf32> to vector<2x128xf32>
    %199 = vector.shape_cast %195 : vector<2x128xf32> to vector<1x2x128xf32>
    tpu.vector_store %arg4[%196, %c0_62, %c0_63], %199 {strides = array<i32>} : memref<8x2x128xf32, #tpu.memory_space<vmem>>, vector<1x2x128xf32>,
    %c5_i32 = arith.constant 5 : i32
    %200 = arith.index_cast %c5_i32 : i32 to index
    %c0_64 = arith.constant 0 : index
    %c0_65 = arith.constant 0 : index
    %201 = vector.load %arg1[%200, %c0_64, %c0_65] : memref<8x2x512xf32, #tpu.memory_space<vmem>>, vector<1x2x512xf32>
    %202 = vector.shape_cast %201 : vector<1x2x512xf32> to vector<2x512xf32>
    %c0_66 = arith.constant 0 : index
    %c0_67 = arith.constant 0 : index
    %203 = vector.load %arg3[%c0_66, %c0_67] : memref<128x512xf32, #tpu.memory_space<vmem>>, vector<128x512xf32>
    %cst_68 = arith.constant dense<0.000000e+00> : vector<2x512xf32>
    %204 = tpu.matmul %191, %203, %cst_68 {dimension_numbers = #tpu.dot_dimension_numbers<[1], [0], [0], [1], [0, 0, 1, 1], [], []>} : vector<2x128xf32>, vector<128x512xf32>, vector<2x512xf32> -> vector<2x512xf32>
    %205 = arith.addf %202, %204 : vector<2x512xf32>
    %206 = vector.extract_strided_slice %205 {offsets = [0, 0], sizes = [2, 128], strides = [1, 1]} : vector<2x512xf32> to vector<2x128xf32>
    %207 = arith.negf %206 : vector<2x128xf32>
    %208 = math.exp %207 : vector<2x128xf32>
    %cst_69 = arith.constant 1.000000e+00 : f32
    %209 = vector.broadcast %cst_69 : f32 to vector<2x128xf32>
    %210 = arith.addf %209, %208 : vector<2x128xf32>
    %211 = arith.divf %209, %210 : vector<2x128xf32>
    %212 = vector.extract_strided_slice %205 {offsets = [0, 128], sizes = [2, 128], strides = [1, 1]} : vector<2x512xf32> to vector<2x128xf32>
    %213 = arith.negf %212 : vector<2x128xf32>
    %214 = math.exp %213 : vector<2x128xf32>
    %cst_70 = arith.constant 1.000000e+00 : f32
    %215 = vector.broadcast %cst_70 : f32 to vector<2x128xf32>
    %216 = arith.addf %215, %214 : vector<2x128xf32>
    %217 = arith.divf %215, %216 : vector<2x128xf32>
    %218 = vector.extract_strided_slice %205 {offsets = [0, 256], sizes = [2, 128], strides = [1, 1]} : vector<2x512xf32> to vector<2x128xf32>
    %219 = math.tanh %218 : vector<2x128xf32>
    %220 = vector.extract_strided_slice %205 {offsets = [0, 384], sizes = [2, 128], strides = [1, 1]} : vector<2x512xf32> to vector<2x128xf32>
    %221 = arith.negf %220 : vector<2x128xf32>
    %222 = math.exp %221 : vector<2x128xf32>
    %cst_71 = arith.constant 1.000000e+00 : f32
    %223 = vector.broadcast %cst_71 : f32 to vector<2x128xf32>
    %224 = arith.addf %223, %222 : vector<2x128xf32>
    %225 = arith.divf %223, %224 : vector<2x128xf32>
    %226 = arith.mulf %217, %189 : vector<2x128xf32>
    %227 = arith.mulf %211, %219 : vector<2x128xf32>
    %228 = arith.addf %226, %227 : vector<2x128xf32>
    %229 = math.tanh %228 : vector<2x128xf32>
    %230 = arith.mulf %225, %229 : vector<2x128xf32>
    %231 = arith.index_cast %c5_i32 : i32 to index
    %c0_72 = arith.constant 0 : index
    %c0_73 = arith.constant 0 : index
    %232 = vector.load %arg2[%231, %c0_72, %c0_73] : memref<8x2x128xf32, #tpu.memory_space<vmem>>, vector<1x2x128xf32>
    %233 = vector.shape_cast %232 : vector<1x2x128xf32> to vector<2x128xf32>
    %234 = arith.addf %230, %233 : vector<2x128xf32>
    %235 = arith.index_cast %c5_i32 : i32 to index
    %c0_74 = arith.constant 0 : index
    %c0_75 = arith.constant 0 : index
    %236 = vector.load %arg4[%235, %c0_74, %c0_75] : memref<8x2x128xf32, #tpu.memory_space<vmem>>, vector<1x2x128xf32>
    %237 = vector.shape_cast %236 : vector<1x2x128xf32> to vector<2x128xf32>
    %238 = vector.shape_cast %234 : vector<2x128xf32> to vector<1x2x128xf32>
    tpu.vector_store %arg4[%235, %c0_74, %c0_75], %238 {strides = array<i32>} : memref<8x2x128xf32, #tpu.memory_space<vmem>>, vector<1x2x128xf32>,
    %c6_i32 = arith.constant 6 : i32
    %239 = arith.index_cast %c6_i32 : i32 to index
    %c0_76 = arith.constant 0 : index
    %c0_77 = arith.constant 0 : index
    %240 = vector.load %arg1[%239, %c0_76, %c0_77] : memref<8x2x512xf32, #tpu.memory_space<vmem>>, vector<1x2x512xf32>
    %241 = vector.shape_cast %240 : vector<1x2x512xf32> to vector<2x512xf32>
    %c0_78 = arith.constant 0 : index
    %c0_79 = arith.constant 0 : index
    %242 = vector.load %arg3[%c0_78, %c0_79] : memref<128x512xf32, #tpu.memory_space<vmem>>, vector<128x512xf32>
    %cst_80 = arith.constant dense<0.000000e+00> : vector<2x512xf32>
    %243 = tpu.matmul %230, %242, %cst_80 {dimension_numbers = #tpu.dot_dimension_numbers<[1], [0], [0], [1], [0, 0, 1, 1], [], []>} : vector<2x128xf32>, vector<128x512xf32>, vector<2x512xf32> -> vector<2x512xf32>
    %244 = arith.addf %241, %243 : vector<2x512xf32>
    %245 = vector.extract_strided_slice %244 {offsets = [0, 0], sizes = [2, 128], strides = [1, 1]} : vector<2x512xf32> to vector<2x128xf32>
    %246 = arith.negf %245 : vector<2x128xf32>
    %247 = math.exp %246 : vector<2x128xf32>
    %cst_81 = arith.constant 1.000000e+00 : f32
    %248 = vector.broadcast %cst_81 : f32 to vector<2x128xf32>
    %249 = arith.addf %248, %247 : vector<2x128xf32>
    %250 = arith.divf %248, %249 : vector<2x128xf32>
    %251 = vector.extract_strided_slice %244 {offsets = [0, 128], sizes = [2, 128], strides = [1, 1]} : vector<2x512xf32> to vector<2x128xf32>
    %252 = arith.negf %251 : vector<2x128xf32>
    %253 = math.exp %252 : vector<2x128xf32>
    %cst_82 = arith.constant 1.000000e+00 : f32
    %254 = vector.broadcast %cst_82 : f32 to vector<2x128xf32>
    %255 = arith.addf %254, %253 : vector<2x128xf32>
    %256 = arith.divf %254, %255 : vector<2x128xf32>
    %257 = vector.extract_strided_slice %244 {offsets = [0, 256], sizes = [2, 128], strides = [1, 1]} : vector<2x512xf32> to vector<2x128xf32>
    %258 = math.tanh %257 : vector<2x128xf32>
    %259 = vector.extract_strided_slice %244 {offsets = [0, 384], sizes = [2, 128], strides = [1, 1]} : vector<2x512xf32> to vector<2x128xf32>
    %260 = arith.negf %259 : vector<2x128xf32>
    %261 = math.exp %260 : vector<2x128xf32>
    %cst_83 = arith.constant 1.000000e+00 : f32
    %262 = vector.broadcast %cst_83 : f32 to vector<2x128xf32>
    %263 = arith.addf %262, %261 : vector<2x128xf32>
    %264 = arith.divf %262, %263 : vector<2x128xf32>
    %265 = arith.mulf %256, %228 : vector<2x128xf32>
    %266 = arith.mulf %250, %258 : vector<2x128xf32>
    %267 = arith.addf %265, %266 : vector<2x128xf32>
    %268 = math.tanh %267 : vector<2x128xf32>
    %269 = arith.mulf %264, %268 : vector<2x128xf32>
    %270 = arith.index_cast %c6_i32 : i32 to index
    %c0_84 = arith.constant 0 : index
    %c0_85 = arith.constant 0 : index
    %271 = vector.load %arg2[%270, %c0_84, %c0_85] : memref<8x2x128xf32, #tpu.memory_space<vmem>>, vector<1x2x128xf32>
    %272 = vector.shape_cast %271 : vector<1x2x128xf32> to vector<2x128xf32>
    %273 = arith.addf %269, %272 : vector<2x128xf32>
    %274 = arith.index_cast %c6_i32 : i32 to index
    %c0_86 = arith.constant 0 : index
    %c0_87 = arith.constant 0 : index
    %275 = vector.load %arg4[%274, %c0_86, %c0_87] : memref<8x2x128xf32, #tpu.memory_space<vmem>>, vector<1x2x128xf32>
    %276 = vector.shape_cast %275 : vector<1x2x128xf32> to vector<2x128xf32>
    %277 = vector.shape_cast %273 : vector<2x128xf32> to vector<1x2x128xf32>
    tpu.vector_store %arg4[%274, %c0_86, %c0_87], %277 {strides = array<i32>} : memref<8x2x128xf32, #tpu.memory_space<vmem>>, vector<1x2x128xf32>,
    %c7_i32 = arith.constant 7 : i32
    %278 = arith.index_cast %c7_i32 : i32 to index
    %c0_88 = arith.constant 0 : index
    %c0_89 = arith.constant 0 : index
    %279 = vector.load %arg1[%278, %c0_88, %c0_89] : memref<8x2x512xf32, #tpu.memory_space<vmem>>, vector<1x2x512xf32>
    %280 = vector.shape_cast %279 : vector<1x2x512xf32> to vector<2x512xf32>
    %c0_90 = arith.constant 0 : index
    %c0_91 = arith.constant 0 : index
    %281 = vector.load %arg3[%c0_90, %c0_91] : memref<128x512xf32, #tpu.memory_space<vmem>>, vector<128x512xf32>
    %cst_92 = arith.constant dense<0.000000e+00> : vector<2x512xf32>
    %282 = tpu.matmul %269, %281, %cst_92 {dimension_numbers = #tpu.dot_dimension_numbers<[1], [0], [0], [1], [0, 0, 1, 1], [], []>} : vector<2x128xf32>, vector<128x512xf32>, vector<2x512xf32> -> vector<2x512xf32>
    %283 = arith.addf %280, %282 : vector<2x512xf32>
    %284 = vector.extract_strided_slice %283 {offsets = [0, 0], sizes = [2, 128], strides = [1, 1]} : vector<2x512xf32> to vector<2x128xf32>
    %285 = arith.negf %284 : vector<2x128xf32>
    %286 = math.exp %285 : vector<2x128xf32>
    %cst_93 = arith.constant 1.000000e+00 : f32
    %287 = vector.broadcast %cst_93 : f32 to vector<2x128xf32>
    %288 = arith.addf %287, %286 : vector<2x128xf32>
    %289 = arith.divf %287, %288 : vector<2x128xf32>
    %290 = vector.extract_strided_slice %283 {offsets = [0, 128], sizes = [2, 128], strides = [1, 1]} : vector<2x512xf32> to vector<2x128xf32>
    %291 = arith.negf %290 : vector<2x128xf32>
    %292 = math.exp %291 : vector<2x128xf32>
    %cst_94 = arith.constant 1.000000e+00 : f32
    %293 = vector.broadcast %cst_94 : f32 to vector<2x128xf32>
    %294 = arith.addf %293, %292 : vector<2x128xf32>
    %295 = arith.divf %293, %294 : vector<2x128xf32>
    %296 = vector.extract_strided_slice %283 {offsets = [0, 256], sizes = [2, 128], strides = [1, 1]} : vector<2x512xf32> to vector<2x128xf32>
    %297 = math.tanh %296 : vector<2x128xf32>
    %298 = vector.extract_strided_slice %283 {offsets = [0, 384], sizes = [2, 128], strides = [1, 1]} : vector<2x512xf32> to vector<2x128xf32>
    %299 = arith.negf %298 : vector<2x128xf32>
    %300 = math.exp %299 : vector<2x128xf32>
    %cst_95 = arith.constant 1.000000e+00 : f32
    %301 = vector.broadcast %cst_95 : f32 to vector<2x128xf32>
    %302 = arith.addf %301, %300 : vector<2x128xf32>
    %303 = arith.divf %301, %302 : vector<2x128xf32>
    %304 = arith.mulf %295, %267 : vector<2x128xf32>
    %305 = arith.mulf %289, %297 : vector<2x128xf32>
    %306 = arith.addf %304, %305 : vector<2x128xf32>
    %307 = math.tanh %306 : vector<2x128xf32>
    %308 = arith.mulf %303, %307 : vector<2x128xf32>
    %309 = arith.index_cast %c7_i32 : i32 to index
    %c0_96 = arith.constant 0 : index
    %c0_97 = arith.constant 0 : index
    %310 = vector.load %arg2[%309, %c0_96, %c0_97] : memref<8x2x128xf32, #tpu.memory_space<vmem>>, vector<1x2x128xf32>
    %311 = vector.shape_cast %310 : vector<1x2x128xf32> to vector<2x128xf32>
    %312 = arith.addf %308, %311 : vector<2x128xf32>
    %313 = arith.index_cast %c7_i32 : i32 to index
    %c0_98 = arith.constant 0 : index
    %c0_99 = arith.constant 0 : index
    %314 = vector.load %arg4[%313, %c0_98, %c0_99] : memref<8x2x128xf32, #tpu.memory_space<vmem>>, vector<1x2x128xf32>
    %315 = vector.shape_cast %314 : vector<1x2x128xf32> to vector<2x128xf32>
    %316 = vector.shape_cast %312 : vector<2x128xf32> to vector<1x2x128xf32>
    tpu.vector_store %arg4[%313, %c0_98, %c0_99], %316 {strides = array<i32>} : memref<8x2x128xf32, #tpu.memory_space<vmem>>, vector<1x2x128xf32>,
    %c8_i32 = arith.constant 8 : i32
    %c0_100 = arith.constant 0 : index
    %c0_101 = arith.constant 0 : index
    %317 = vector.load %arg7[%c0_100, %c0_101] : memref<2x128xf32, #tpu.memory_space<vmem>>, vector<2x128xf32>
    tpu.vector_store %arg7[%c0_100, %c0_101], %308 {strides = array<i32>} : memref<2x128xf32, #tpu.memory_space<vmem>>, vector<2x128xf32>,
    %c0_102 = arith.constant 0 : index
    %c0_103 = arith.constant 0 : index
    %318 = vector.load %arg8[%c0_102, %c0_103] : memref<2x128xf32, #tpu.memory_space<vmem>>, vector<2x128xf32>
    tpu.vector_store %arg8[%c0_102, %c0_103], %306 {strides = array<i32>} : memref<2x128xf32, #tpu.memory_space<vmem>>, vector<2x128xf32>,
    %c0_104 = arith.constant 0 : index
    %c0_105 = arith.constant 0 : index
    %c0_106 = arith.constant 0 : index
    %319 = vector.load %arg5[%c0_104, %c0_105, %c0_106] : memref<1x2x128xf32, #tpu.memory_space<vmem>>, vector<1x2x128xf32>
    %320 = vector.shape_cast %319 : vector<1x2x128xf32> to vector<2x128xf32>
    %321 = vector.shape_cast %308 : vector<2x128xf32> to vector<1x2x128xf32>
    tpu.vector_store %arg5[%c0_104, %c0_105, %c0_106], %321 {strides = array<i32>} : memref<1x2x128xf32, #tpu.memory_space<vmem>>, vector<1x2x128xf32>,
    %c0_107 = arith.constant 0 : index
    %c0_108 = arith.constant 0 : index
    %c0_109 = arith.constant 0 : index
    %322 = vector.load %arg6[%c0_107, %c0_108, %c0_109] : memref<1x2x128xf32, #tpu.memory_space<vmem>>, vector<1x2x128xf32>
    %323 = vector.shape_cast %322 : vector<1x2x128xf32> to vector<2x128xf32>
    %324 = vector.shape_cast %306 : vector<2x128xf32> to vector<1x2x128xf32>
    tpu.vector_store %arg6[%c0_107, %c0_108, %c0_109], %324 {strides = array<i32>} : memref<1x2x128xf32, #tpu.memory_space<vmem>>, vector<1x2x128xf32>,
    return
  }
  func.func @transform_0(%arg0: i32) -> (i32, i32, i32) {
    %c0_i32 = arith.constant 0 : i32
    %c0_i32_0 = arith.constant 0 : i32
    %c0_i32_1 = arith.constant 0 : i32
    return %arg0, %c0_i32, %c0_i32_0 : i32, i32, i32
  }
  func.func @transform_1(%arg0: i32) -> (i32, i32, i32) {
    %c0_i32 = arith.constant 0 : i32
    %c0_i32_0 = arith.constant 0 : i32
    %c0_i32_1 = arith.constant 0 : i32
    return %arg0, %c0_i32, %c0_i32_0 : i32, i32, i32
  }
  func.func @transform_2(%arg0: i32) -> (i32, i32) {
    %c0_i32 = arith.constant 0 : i32
    %c0_i32_0 = arith.constant 0 : i32
    %c0_i32_1 = arith.constant 0 : i32
    return %c0_i32, %c0_i32_0 : i32, i32
  }
  func.func @transform_3(%arg0: i32) -> (i32, i32, i32) {
    %c0_i32 = arith.constant 0 : i32
    %c0_i32_0 = arith.constant 0 : i32
    %c0_i32_1 = arith.constant 0 : i32
    return %arg0, %c0_i32, %c0_i32_0 : i32, i32, i32
  }
  func.func @transform_4(%arg0: i32) -> (i32, i32, i32) {
    %c0_i32 = arith.constant 0 : i32
    %c0_i32_0 = arith.constant 0 : i32
    %c0_i32_1 = arith.constant 0 : i32
    %c0_i32_2 = arith.constant 0 : i32
    return %c0_i32, %c0_i32_0, %c0_i32_1 : i32, i32, i32
  }
  func.func @transform_5(%arg0: i32) -> (i32, i32, i32) {
    %c0_i32 = arith.constant 0 : i32
    %c0_i32_0 = arith.constant 0 : i32
    %c0_i32_1 = arith.constant 0 : i32
    %c0_i32_2 = arith.constant 0 : i32
    return %c0_i32, %c0_i32_0, %c0_i32_1 : i32, i32, i32
  }
}

</mosaic_0001>

<bundles_post_ra>
// kernel: skip_connection_lstm.1
= control target key start
LH: loop header
LB: loop body
LE: loop exit
PB: predicated region body
PF: predicated region fallthrough
CT: control target
= control target key end

     0   :  { %11 = vsyncpa [#allocation5], 0  ;;  %v2192_v4 = vmov 0.0   ;;  %s3881_s0 = inlined_call_operand.vmem [shape: f32[8,2,512], index: 0, kind: input, shape index: {}]   ;;  %s3882_s1 = inlined_call_operand.vmem [shape: f32[8,2,128], index: 1, kind: input, shape index: {}]   ;;  %s3883_s2 = inlined_call_operand.vmem [shape: f32[128,512], index: 2, kind: input, shape index: {}]   ;;  %s3884_s3 = inlined_call_operand.hbm [shape: f32[8,2,128], index: 3, kind: output, shape index: {0}]   ;;  %s3885_s4 = inlined_call_operand.hbm [shape: f32[1,2,128], index: 4, kind: output, shape index: {1}]   ;;  %s3886_s5 = inlined_call_operand.hbm [shape: f32[1,2,128], index: 5, kind: output, shape index: {2}]  }
   0x1   :  { %v2231_v0 = vld [vmem:[%s3883_s2 + $0x1f0] sm:$0xff]  ;;  %v2236_v1 = vld [vmem:[%s3883_s2 + $0x1f8] sm:$0xff]  ;;  %23 = vst [vmem:[#allocation2] sm:$0x3] %v2192_v4  ;;  %v2263_v7 = vld [vmem:[%s3883_s2 + $0x1e8] sm:$0xff] }
   0x2   :  { %v2241_v2 = vld [vmem:[%s3883_s2 + $0x1d0] sm:$0xff]  ;;  %132 = vmatpush.msra.mxu2 %v2231_v0  ;;  %152 = vmatpush.msra.mxu3 %v2236_v1  ;;  %v2248_v3 = vld [vmem:[%s3883_s2 + $0x1d8] sm:$0xff]  ;;  %24 = vst [vmem:[#allocation3] sm:$0x3] %v2192_v4  ;;  %v2270_v8 = vld [vmem:[%s3883_s2 + $0x1e0] sm:$0xff] }
   0x3   :  { %v2253_v5 = vld [vmem:[%s3883_s2 + $0x1b0] sm:$0xff]  ;;  %v2258_v6 = vld [vmem:[%s3883_s2 + $0x1b8] sm:$0xff]  ;;  %v2275_v9 = vld [vmem:[%s3883_s2 + $0x1c8] sm:$0xff]  ;;  %112 = vmatpush.msra.mxu1 %v2263_v7  ;;  %92 = vmatpush.msra.mxu0 %v2270_v8 }
   0x4   :  { %133 = vmatpush.msra.mxu2 %v2241_v2  ;;  %153 = vmatpush.msra.mxu3 %v2248_v3  ;;  %v2281_v10 = vld [vmem:[%s3883_s2 + $0x190] sm:$0xff]  ;;  %v2286_v11 = vld [vmem:[%s3883_s2 + $0x198] sm:$0xff]  ;;  %v2292_v12 = vld [vmem:[%s3883_s2 + $0x1c0] sm:$0xff] }
   0x5   :  { %v2299_v13 = vld [vmem:[%s3883_s2 + $0x1a8] sm:$0xff]  ;;  %v2304_v14 = vld [vmem:[%s3883_s2 + $0x1a0] sm:$0xff]  ;;  %113 = vmatpush.msra.mxu1 %v2275_v9  ;;  %v2310_v15 = vld [vmem:[%s3883_s2 + $0x170] sm:$0xff]  ;;  %93 = vmatpush.msra.mxu0 %v2292_v12 }
   0x6   :  { %134 = vmatpush.msra.mxu2 %v2253_v5  ;;  %154 = vmatpush.msra.mxu3 %v2258_v6  ;;  %v2315_v16 = vld [vmem:[%s3883_s2 + $0x178] sm:$0xff]  ;;  %v2323_v17 = vld [vmem:[%s3883_s2 + $0x188] sm:$0xff]  ;;  %v2328_v18 = vld [vmem:[%s3883_s2 + $0x180] sm:$0xff] }
   0x7   :  { %114 = vmatpush.msra.mxu1 %v2299_v13  ;;  %v2334_v19 = vld [vmem:[%s3883_s2 + $0x150] sm:$0xff]  ;;  %v2339_v20 = vld [vmem:[%s3883_s2 + $0x158] sm:$0xff]  ;;  %94 = vmatpush.msra.mxu0 %v2304_v14  ;;  %v2347_v21 = vld [vmem:[%s3883_s2 + $0x168] sm:$0xff] }
   0x8   :  { %135 = vmatpush.msra.mxu2 %v2281_v10  ;;  %155 = vmatpush.msra.mxu3 %v2286_v11  ;;  %v2352_v22 = vld [vmem:[%s3883_s2 + $0x160] sm:$0xff]  ;;  %v2358_v23 = vld [vmem:[%s3883_s2 + $0x130] sm:$0xff]  ;;  %v2363_v24 = vld [vmem:[%s3883_s2 + $0x138] sm:$0xff] }
   0x9   :  { %115 = vmatpush.msra.mxu1 %v2323_v17  ;;  %95 = vmatpush.msra.mxu0 %v2328_v18  ;;  %v2371_v25 = vld [vmem:[%s3883_s2 + $0x148] sm:$0xff]  ;;  %v2376_v26 = vld [vmem:[%s3883_s2 + $0x140] sm:$0xff]  ;;  %v2382_v27 = vld [vmem:[%s3883_s2 + $0x110] sm:$0xff] }
   0xa   :  { %136 = vmatpush.msra.mxu2 %v2310_v15  ;;  %156 = vmatpush.msra.mxu3 %v2315_v16  ;;  %v2387_v28 = vld [vmem:[%s3883_s2 + $0x118] sm:$0xff]  ;;  %v2395_v29 = vld [vmem:[%s3883_s2 + $0x128] sm:$0xff]  ;;  %v2400_v30 = vld [vmem:[%s3883_s2 + $0x120] sm:$0xff] }
   0xb   :  { %116 = vmatpush.msra.mxu1 %v2347_v21  ;;  %96 = vmatpush.msra.mxu0 %v2352_v22  ;;  %v2406_v31 = vld [vmem:[%s3883_s2 + $0xf0] sm:$0xff]  ;;  %v2411_v32 = vld [vmem:[%s3883_s2 + $0xf8] sm:$0xff]  ;;  %v2419_v33 = vld [vmem:[%s3883_s2 + $0x108] sm:$0xff] }
   0xc   :  { %137 = vmatpush.msra.mxu2 %v2334_v19  ;;  %157 = vmatpush.msra.mxu3 %v2339_v20  ;;  %v2424_v34 = vld [vmem:[%s3883_s2 + $0x100] sm:$0xff]  ;;  %v2430_v35 = vld [vmem:[%s3883_s2 + $0xd0] sm:$0xff]  ;;  %v2435_v36 = vld [vmem:[%s3883_s2 + $0xd8] sm:$0xff] }
   0xd   :  { %117 = vmatpush.msra.mxu1 %v2371_v25  ;;  %97 = vmatpush.msra.mxu0 %v2376_v26  ;;  %v2443_v37 = vld [vmem:[%s3883_s2 + $0xe8] sm:$0xff]  ;;  %v2448_v38 = vld [vmem:[%s3883_s2 + $0xe0] sm:$0xff]  ;;  %v2454_v39 = vld [vmem:[%s3883_s2 + $0xb0] sm:$0xff] }
   0xe   :  { %138 = vmatpush.msra.mxu2 %v2358_v23  ;;  %158 = vmatpush.msra.mxu3 %v2363_v24  ;;  %v2459_v40 = vld [vmem:[%s3883_s2 + $0xb8] sm:$0xff]  ;;  %v2467_v41 = vld [vmem:[%s3883_s2 + $0xc8] sm:$0xff]  ;;  %v2472_v42 = vld [vmem:[%s3883_s2 + $0xc0] sm:$0xff] }
   0xf   :  { %118 = vmatpush.msra.mxu1 %v2395_v29  ;;  %98 = vmatpush.msra.mxu0 %v2400_v30  ;;  %v2478_v43 = vld [vmem:[%s3883_s2 + $0x90] sm:$0xff]  ;;  %v2483_v44 = vld [vmem:[%s3883_s2 + $0x98] sm:$0xff]  ;;  %v2491_v45 = vld [vmem:[%s3883_s2 + $0xa8] sm:$0xff] }
  0x10   :  { %139 = vmatpush.msra.mxu2 %v2382_v27  ;;  %159 = vmatpush.msra.mxu3 %v2387_v28  ;;  %v2496_v46 = vld [vmem:[%s3883_s2 + $0xa0] sm:$0xff] }
  0x11   :  { %119 = vmatpush.msra.mxu1 %v2419_v33  ;;  %99 = vmatpush.msra.mxu0 %v2424_v34 }
  0x12   :  { %140 = vmatpush.msra.mxu2 %v2406_v31  ;;  %160 = vmatpush.msra.mxu3 %v2411_v32 }
  0x13   :  { %120 = vmatpush.msra.mxu1 %v2443_v37  ;;  %100 = vmatpush.msra.mxu0 %v2448_v38 }
  0x14   :  { %141 = vmatpush.msra.mxu2 %v2430_v35  ;;  %161 = vmatpush.msra.mxu3 %v2435_v36 }
  0x16   :  { %142 = vmatpush.msra.mxu2 %v2454_v39  ;;  %162 = vmatpush.msra.mxu3 %v2459_v40 }
  0x17   :  { %12 = vsyncpa [#allocation7], 0  ;;  %121 = vmatpush.msra.mxu1 %v2467_v41  ;;  %v2502_v47 = vld [vmem:[%s3883_s2 + $0x70] sm:$0xff]  ;;  %v2507_v48 = vld [vmem:[%s3883_s2 + $0x78] sm:$0xff]  ;;  %101 = vmatpush.msra.mxu0 %v2472_v42  ;;  %vm179_vm0 = vcmask 1041408   ;;  %vm181_vm1 = vcmask 1045508  }
  0x18   :  { %143 = vmatpush.msra.mxu2 %v2478_v43  ;;  %163 = vmatpush.msra.mxu3 %v2483_v44  ;;  %v2515_v49 = vld [vmem:[%s3883_s2 + $0x88] sm:$0xff]  ;;  %v2520_v50 = vld [vmem:[%s3883_s2 + $0x80] sm:$0xff]  ;;  %v2526_v51 = vld [vmem:[%s3883_s2 + $0x50] sm:$0xff]  ;;  %vm183_vm2 = vcmask 1043456   ;;  %s1915_s9 = sshll.u32 %s3885_s4, 4  ;;  %s2194_s10 = smov [#allocation4]   ;;  %s1916_s9 = int_to_ptr.hbm [resolvable:$true] %s1915_s9 }
  0x19   :  { %122 = vmatpush.msra.mxu1 %v2491_v45  ;;  %v2531_v52 = vld [vmem:[%s3883_s2 + $0x58] sm:$0xff]  ;;  %102 = vmatpush.msra.mxu0 %v2496_v46  ;;  %v2539_v53 = vld [vmem:[%s3883_s2 + $0x68] sm:$0xff]  ;;  %v2544_v54 = vld [vmem:[%s3883_s2 + $0x60] sm:$0xff]  ;;  %s1899_s11 = sshll.u32 %s2194_s10, 4  ;;  %s1901_s14 = sshll.u32 %s3884_s3, 4  ;;  %s1900_s11 = int_to_ptr.vmem [resolvable:$true] %s1899_s11  ;;  %s1902_s14 = int_to_ptr.hbm [resolvable:$true] %s1901_s14 }
  0x1a   :  { %144 = vmatpush.msra.mxu2 %v2502_v47  ;;  %164 = vmatpush.msra.mxu3 %v2507_v48  ;;  %v2550_v55 = vld [vmem:[%s3883_s2 + $0x30] sm:$0xff]  ;;  %v2555_v56 = vld [vmem:[%s3883_s2 + $0x38] sm:$0xff]  ;;  %v2563_v57 = vld [vmem:[%s3883_s2 + $0x48] sm:$0xff]  ;;  %s2195_s17 = smov [#allocation8]   ;;  %s1926_s20 = sshll.u32 %s3886_s5, 4  ;;  %s1927_s20 = int_to_ptr.hbm [resolvable:$true] %s1926_s20 }
  0x1b   :  { %123 = vmatpush.msra.mxu1 %v2515_v49  ;;  %3922 = vst [vmem:[#allocation11_spill] sm:$0xff] %v2555_v56  ;;  %103 = vmatpush.msra.mxu0 %v2520_v50  ;;  %v2568_v58 = vld [vmem:[%s3883_s2 + $0x40] sm:$0xff]  ;;  %v2574_v59 = vld [vmem:[%s3883_s2 + $0x10] sm:$0xff]  ;;  %v2579_v60 = vld [vmem:[%s3883_s2 + $0x18] sm:$0xff]  ;;  %s1924_s18 = sshll.u32 %s2195_s17, 4  ;;  %s2196_s3 = smov 32   ;;  %s1925_s18 = int_to_ptr.vmem [resolvable:$true] %s1924_s18 }
  0x1c   :  { %145 = vmatpush.msra.mxu2 %v2526_v51  ;;  %165 = vmatpush.msra.mxu3 %v2531_v52  ;;  %v25_v61 = vld [vmem:[#allocation2] sm:$0x3]  ;;  %v2589_v62 = vld [vmem:[%s3883_s2 + $0x28] sm:$0xff] }
  0x1d   :  { %124 = vmatpush.msra.mxu1 %v2539_v53  ;;  %104 = vmatpush.msra.mxu0 %v2544_v54  ;;  %v2594_v63 = vld [vmem:[%s3883_s2 + $0x20] sm:$0xff]  ;;  %v2601_v4 = vld [vmem:[%s3883_s2 + $0x8] sm:$0xff] }
  0x1e   :  { %146 = vmatpush.msra.mxu2 %v2550_v55  ;;  %166 = vmatpush.msra.mxu3 %v2555_v56  ;;  %v2606_v56 = vld [vmem:[%s3883_s2] sm:$0xff] }
  0x1f   :  { %125 = vmatpush.msra.mxu1 %v2563_v57  ;;  %105 = vmatpush.msra.mxu0 %v2568_v58 }
  0x20   :  { %147 = vmatpush.msra.mxu2 %v2574_v59  ;;  %167 = vmatpush.msra.mxu3 %v2579_v60 }
  0x21   :  { %148 = vmatmul.f32.vlgmr.msra.gmra.mxu2 %v25_v61  ;;  %168 = vmatmul.f32.vlgmr.msra.gmra.mxu3 %v25_v61 }
  0x22   :  { %126 = vmatpush.msra.mxu1 %v2589_v62  ;;  %106 = vmatpush.msra.mxu0 %v2594_v63 }
  0x23   :  { %366 = vmatpush.msrb.mxu2 %v2231_v0  ;;  %386 = vmatpush.msrb.mxu3 %v2236_v1 }
  0x24   :  { %127 = vmatpush.msra.mxu1 %v2601_v4  ;;  %107 = vmatpush.msra.mxu0 %v2606_v56 }
  0x25   :  { %128 = vmatmul.f32.vlgmr.msra.gmra.mxu1 %v25_v61  ;;  %108 = vmatmul.f32.vlgmr.msra.gmra.mxu0 %v25_v61  ;;  %v3923_v61 = vld [vmem:[#allocation11_spill] sm:$0xff] }
  0x26   :  { %326 = vmatpush.msrb.mxu0 %v2270_v8  ;;  %346 = vmatpush.msrb.mxu1 %v2263_v7 }
  0x27   :  { %367 = vmatpush.msrb.mxu2 %v2241_v2  ;;  %387 = vmatpush.msrb.mxu3 %v2248_v3 }
  0x28   :  { %327 = vmatpush.msrb.mxu0 %v2292_v12  ;;  %347 = vmatpush.msrb.mxu1 %v2275_v9 }
  0x29   :  { %368 = vmatpush.msrb.mxu2 %v2253_v5  ;;  %388 = vmatpush.msrb.mxu3 %v2258_v6 }
  0x2a   :  { %328 = vmatpush.msrb.mxu0 %v2304_v14  ;;  %348 = vmatpush.msrb.mxu1 %v2299_v13 }
  0x2b   :  { %369 = vmatpush.msrb.mxu2 %v2281_v10  ;;  %389 = vmatpush.msrb.mxu3 %v2286_v11 }
  0x2c   :  { %329 = vmatpush.msrb.mxu0 %v2328_v18  ;;  %349 = vmatpush.msrb.mxu1 %v2323_v17 }
  0x2d   :  { %370 = vmatpush.msrb.mxu2 %v2310_v15  ;;  %390 = vmatpush.msrb.mxu3 %v2315_v16 }
  0x2e   :  { %330 = vmatpush.msrb.mxu0 %v2352_v22  ;;  %350 = vmatpush.msrb.mxu1 %v2347_v21 }
  0x2f   :  { %371 = vmatpush.msrb.mxu2 %v2334_v19  ;;  %391 = vmatpush.msrb.mxu3 %v2339_v20 }
  0x30   :  { %331 = vmatpush.msrb.mxu0 %v2376_v26  ;;  %351 = vmatpush.msrb.mxu1 %v2371_v25 }
  0x31   :  { %372 = vmatpush.msrb.mxu2 %v2358_v23  ;;  %392 = vmatpush.msrb.mxu3 %v2363_v24 }
  0x32   :  { %332 = vmatpush.msrb.mxu0 %v2400_v30  ;;  %352 = vmatpush.msrb.mxu1 %v2395_v29 }
  0x33   :  { %373 = vmatpush.msrb.mxu2 %v2382_v27  ;;  %393 = vmatpush.msrb.mxu3 %v2387_v28 }
  0x34   :  { %333 = vmatpush.msrb.mxu0 %v2424_v34  ;;  %353 = vmatpush.msrb.mxu1 %v2419_v33 }
  0x35   :  { %374 = vmatpush.msrb.mxu2 %v2406_v31  ;;  %394 = vmatpush.msrb.mxu3 %v2411_v32 }
  0x36   :  { %334 = vmatpush.msrb.mxu0 %v2448_v38  ;;  %354 = vmatpush.msrb.mxu1 %v2443_v37 }
  0x37   :  { %375 = vmatpush.msrb.mxu2 %v2430_v35  ;;  %395 = vmatpush.msrb.mxu3 %v2435_v36 }
  0x38   :  { %335 = vmatpush.msrb.mxu0 %v2472_v42  ;;  %355 = vmatpush.msrb.mxu1 %v2467_v41 }
  0x39   :  { %376 = vmatpush.msrb.mxu2 %v2454_v39  ;;  %396 = vmatpush.msrb.mxu3 %v2459_v40 }
  0x3a   :  { %336 = vmatpush.msrb.mxu0 %v2496_v46  ;;  %356 = vmatpush.msrb.mxu1 %v2491_v45 }
  0x3b   :  { %377 = vmatpush.msrb.mxu2 %v2478_v43  ;;  %397 = vmatpush.msrb.mxu3 %v2483_v44 }
  0x3c   :  { %337 = vmatpush.msrb.mxu0 %v2520_v50  ;;  %357 = vmatpush.msrb.mxu1 %v2515_v49 }
  0x3d   :  { %378 = vmatpush.msrb.mxu2 %v2502_v47  ;;  %398 = vmatpush.msrb.mxu3 %v2507_v48 }
  0x3e   :  { %338 = vmatpush.msrb.mxu0 %v2544_v54  ;;  %358 = vmatpush.msrb.mxu1 %v2539_v53 }
  0x3f   :  { %379 = vmatpush.msrb.mxu2 %v2526_v51  ;;  %399 = vmatpush.msrb.mxu3 %v2531_v52 }
  0x40   :  { %339 = vmatpush.msrb.mxu0 %v2568_v58  ;;  %359 = vmatpush.msrb.mxu1 %v2563_v57 }
  0x41   :  { %380 = vmatpush.msrb.mxu2 %v2550_v55  ;;  %400 = vmatpush.msrb.mxu3 %v3923_v61 }
  0x42   :  { %340 = vmatpush.msrb.mxu0 %v2594_v63  ;;  %360 = vmatpush.msrb.mxu1 %v2589_v62 }
  0x43   :  { %381 = vmatpush.msrb.mxu2 %v2574_v59  ;;  %401 = vmatpush.msrb.mxu3 %v2579_v60 }
  0x44   :  { %341 = vmatpush.msrb.mxu0 %v2606_v56  ;;  %361 = vmatpush.msrb.mxu1 %v2601_v4 }
  0x45   :  { %599 = vmatpush.msra.mxu2 %v2231_v0  ;;  %619 = vmatpush.msra.mxu3 %v2236_v1 }
  0x46   :  { %559 = vmatpush.msra.mxu0 %v2270_v8  ;;  %579 = vmatpush.msra.mxu1 %v2263_v7 }
  0x47   :  { %600 = vmatpush.msra.mxu2 %v2241_v2  ;;  %620 = vmatpush.msra.mxu3 %v2248_v3 }
  0x48   :  { %560 = vmatpush.msra.mxu0 %v2292_v12  ;;  %580 = vmatpush.msra.mxu1 %v2275_v9  ;;  %v27_v9 = vld [vmem:[%s3881_s0] sm:$0xff] }
  0x49   :  { %601 = vmatpush.msra.mxu2 %v2253_v5  ;;  %621 = vmatpush.msra.mxu3 %v2258_v6 }
  0x4a   :  { %561 = vmatpush.msra.mxu0 %v2304_v14  ;;  %581 = vmatpush.msra.mxu1 %v2299_v13 }
  0x4b   :  { %602 = vmatpush.msra.mxu2 %v2281_v10  ;;  %622 = vmatpush.msra.mxu3 %v2286_v11 }
  0x4c   :  { %562 = vmatpush.msra.mxu0 %v2328_v18  ;;  %582 = vmatpush.msra.mxu1 %v2323_v17 }
  0x4d   :  { %603 = vmatpush.msra.mxu2 %v2310_v15  ;;  %623 = vmatpush.msra.mxu3 %v2315_v16 }
  0x4e   :  { %563 = vmatpush.msra.mxu0 %v2352_v22  ;;  %583 = vmatpush.msra.mxu1 %v2347_v21 }
  0x4f   :  { %604 = vmatpush.msra.mxu2 %v2334_v19  ;;  %624 = vmatpush.msra.mxu3 %v2339_v20 }
  0x50   :  { %564 = vmatpush.msra.mxu0 %v2376_v26  ;;  %584 = vmatpush.msra.mxu1 %v2371_v25 }
  0x51   :  { %605 = vmatpush.msra.mxu2 %v2358_v23  ;;  %625 = vmatpush.msra.mxu3 %v2363_v24 }
  0x52   :  { %565 = vmatpush.msra.mxu0 %v2400_v30  ;;  %585 = vmatpush.msra.mxu1 %v2395_v29 }
  0x53   :  { %606 = vmatpush.msra.mxu2 %v2382_v27  ;;  %626 = vmatpush.msra.mxu3 %v2387_v28 }
  0x54   :  { %566 = vmatpush.msra.mxu0 %v2424_v34  ;;  %586 = vmatpush.msra.mxu1 %v2419_v33 }
  0x55   :  { %607 = vmatpush.msra.mxu2 %v2406_v31  ;;  %627 = vmatpush.msra.mxu3 %v2411_v32 }
  0x56   :  { %567 = vmatpush.msra.mxu0 %v2448_v38  ;;  %587 = vmatpush.msra.mxu1 %v2443_v37 }
  0x57   :  { %608 = vmatpush.msra.mxu2 %v2430_v35  ;;  %628 = vmatpush.msra.mxu3 %v2435_v36 }
  0x58   :  { %568 = vmatpush.msra.mxu0 %v2472_v42  ;;  %588 = vmatpush.msra.mxu1 %v2467_v41 }
  0x59   :  { %609 = vmatpush.msra.mxu2 %v2454_v39  ;;  %629 = vmatpush.msra.mxu3 %v2459_v40 }
  0x5a   :  { %569 = vmatpush.msra.mxu0 %v2496_v46  ;;  %589 = vmatpush.msra.mxu1 %v2491_v45  ;;  %v26_v45 = vld [vmem:[#allocation3] sm:$0x3] }
  0x5b   :  { %610 = vmatpush.msra.mxu2 %v2478_v43  ;;  %630 = vmatpush.msra.mxu3 %v2483_v44 }
  0x5c   :  { %570 = vmatpush.msra.mxu0 %v2520_v50  ;;  %590 = vmatpush.msra.mxu1 %v2515_v49 }
  0x5d   :  { %611 = vmatpush.msra.mxu2 %v2502_v47  ;;  %631 = vmatpush.msra.mxu3 %v2507_v48 }
  0x5e   :  { %571 = vmatpush.msra.mxu0 %v2544_v54  ;;  %591 = vmatpush.msra.mxu1 %v2539_v53 }
  0x5f   :  { %612 = vmatpush.msra.mxu2 %v2526_v51  ;;  %632 = vmatpush.msra.mxu3 %v2531_v52 }
  0x60   :  { %572 = vmatpush.msra.mxu0 %v2568_v58  ;;  %592 = vmatpush.msra.mxu1 %v2563_v57 }
  0x61   :  { %613 = vmatpush.msra.mxu2 %v2550_v55  ;;  %633 = vmatpush.msra.mxu3 %v3923_v61 }
  0x62   :  { %573 = vmatpush.msra.mxu0 %v2594_v63  ;;  %593 = vmatpush.msra.mxu1 %v2589_v62  ;;  %v257_v62 = vld [vmem:[%s3882_s1] sm:$0x3] }
  0x63   :  { %614 = vmatpush.msra.mxu2 %v2574_v59  ;;  %634 = vmatpush.msra.mxu3 %v2579_v60 }
  0x64   :  { %574 = vmatpush.msra.mxu0 %v2606_v56  ;;  %594 = vmatpush.msra.mxu1 %v2601_v4 }
  0xa2   :  { %v129_v0 = vpop.f32.mrf.mxu1  ;;  %v109_v1 = vpop.f32.mrf.mxu0 }
  0xa3   :  { %v176_v2 = vrot.slane %v129_v0, 6 }
  0xa4   :  { %v149_v3 = vpop.f32.mrf.mxu2  ;;  %v169_v5 = vpop.f32.mrf.mxu3 }
  0xa5   :  { %v177_v6 = vrot.slane %v149_v3, 4  ;;  %v178_v7 = vrot.slane %v169_v5, 2  ;;  %v180_v8 = vsel %vm179_vm0, %v109_v1, %v176_v2 }
  0xa7   :  { %v182_v10 = vsel %vm181_vm1, %v177_v6, %v178_v7  ;;  %v1947_v7 = vld [vmem:[%s3881_s0 + $0x8] sm:$0xff] }
  0xa8   :  { %v184_v11 = vsel %vm183_vm2, %v180_v8, %v182_v10 }
  0xa9   :  { %v186_v12 = vadd.f32 %v184_v11, %v27_v9 }
  0xab   :  { %v1944_v13 = vmul.f32 -1.442695, %v186_v12  ;;  %v207_v14 = vrot.slane %v186_v12, 2  ;;  %v231_v15 = vrot.slane %v186_v12, 6  ;;  %v228_v28 = vrot.slane %v186_v12, 4 }
  0xad   :  { %1988 = vpow2.f32 %v1944_v13  ;;  %v1945_v16 = vmul.f32 -1.442695, %v207_v14  ;;  %v1946_v17 = vmul.f32 -1.442695, %v231_v15 }
  0xaf   :  { %1990 = vpow2.f32 %v1945_v16 }
  0xb0   :  { %1992 = vpow2.f32 %v1946_v17 }
  0xb3   :  { %v1989_v18 = vpop.eup %1988 }
  0xb4   :  { %v190_v19 = vadd.f32 1.0, %v1989_v18 }
  0xb5   :  { %v1991_v20 = vpop.eup %1990 }
  0xb6   :  { %v1993_v21 = vpop.eup %1992  ;;  %1994 = vrcp.f32 %v190_v19  ;;  %v212_v22 = vadd.f32 1.0, %v1991_v20  ;;  %v202_v32 = vand.u32 2147483648, %v190_v19  ;;  %v200_v34 = vand.u32 2147483647, %v190_v19 }
  0xb7   :  { %v236_v23 = vadd.f32 1.0, %v1993_v21  ;;  %vm196_vm4 = vweird.f32 %v190_v19 }
  0xb8   :  { %1996 = vrcp.f32 %v212_v22  ;;  %v224_v37 = vand.u32 2147483648, %v212_v22  ;;  %v222_v39 = vand.u32 2147483647, %v212_v22  ;;  %v203_v41 = vor.u32 1.1754944e-38, %v202_v32 }
  0xb9   :  { %1998 = vrcp.f32 %v236_v23  ;;  %vm201_vm7 = vcmp.eq.f32.partialorder %v200_v34, 8.507059e+37  ;;  %vm218_vm8 = vweird.f32 %v212_v22  ;;  %v248_v55 = vand.u32 2147483648, %v236_v23 }
  0xba   :  { %2000 = vtanh.f32 %v228_v28  ;;  %v225_v46 = vor.u32 1.1754944e-38, %v224_v37  ;;  %vm223_vm10 = vcmp.eq.f32.partialorder %v222_v39, 8.507059e+37  ;;  %vm242_vm12 = vweird.f32 %v236_v23 }
  0xbb   :  { %v246_v56 = vand.u32 2147483647, %v236_v23  ;;  %v249_v58 = vor.u32 1.1754944e-38, %v248_v55 }
  0xbc   :  { %v1995_v24 = vpop.eup %1994 }
  0xbd   :  { %v192_v25 = vmul.f32 %v1995_v24, %v190_v19  ;;  %vm197_vm3 = vweird.f32 %v1995_v24  ;;  %vm247_vm14 = vcmp.eq.f32.partialorder %v246_v56, 8.507059e+37 }
  0xbe   :  { %v1997_v26 = vpop.eup %1996  ;;  %vm198_vm5 = vmor %vm196_vm4, %vm197_vm3 }
  0xbf   :  { %v193_v27 = vsub.f32 1.0, %v192_v25  ;;  %v1999_v29 = vpop.eup %1998  ;;  %v214_v30 = vmul.f32 %v1997_v26, %v212_v22  ;;  %vm219_vm6 = vweird.f32 %v1997_v26 }
  0xc0   :  { %v238_v33 = vmul.f32 %v1999_v29, %v236_v23  ;;  %vm220_vm9 = vmor %vm218_vm8, %vm219_vm6  ;;  %v2001_v48 = vpop.eup %2000  ;;  %vm243_vm11 = vweird.f32 %v1999_v29 }
  0xc1   :  { %v194_v31 = vmul.f32 %v1995_v24, %v193_v27  ;;  %v215_v35 = vsub.f32 1.0, %v214_v30  ;;  %vm244_vm13 = vmor %vm242_vm12, %vm243_vm11 }
  0xc2   :  { %v239_v42 = vsub.f32 1.0, %v238_v33 }
  0xc3   :  { %v195_v36 = vadd.f32 %v1995_v24, %v194_v31  ;;  %v216_v38 = vmul.f32 %v1997_v26, %v215_v35 }
  0xc4   :  { %v240_v50 = vmul.f32 %v1999_v29, %v239_v42 }
  0xc5   :  { %v199_v40 = vsel %vm198_vm5, %v1995_v24, %v195_v36  ;;  %v217_v43 = vadd.f32 %v1997_v26, %v216_v38 }
  0xc6   :  { %v204_v44 = vsel %vm201_vm7, %v203_v41, %v199_v40  ;;  %v241_v54 = vadd.f32 %v1999_v29, %v240_v50 }
  0xc7   :  { %v221_v47 = vsel %vm220_vm9, %v1997_v26, %v217_v43  ;;  %v253_v51 = vmul.f32 %v2001_v48, %v204_v44 }
  0xc8   :  { %v226_v49 = vsel %vm223_vm10, %v225_v46, %v221_v47  ;;  %v245_v57 = vsel %vm244_vm13, %v1999_v29, %v241_v54 }
  0xc9   :  { %v252_v52 = vmul.f32 %v226_v49, %v26_v45  ;;  %v250_v60 = vsel %vm247_vm14, %v249_v58, %v245_v57 }
  0xcb   :  { %v2746_v53 = vadd.f32 %v253_v51, %v252_v52 }
  0xcd   :  { %2002 = vtanh.f32 %v2746_v53 }
  0xd3   :  { %v2003_v59 = vpop.eup %2002 }
  0xd4   :  { %v256_v63 = vmul.f32 %v2003_v59, %v250_v60 }
  0xd6   :  { %v258_v4 = vadd.f32 %v257_v62, %v256_v63  ;;  %342 = vmatmul.f32.vlgmr.msrb.gmra.mxu0 %v256_v63  ;;  %362 = vmatmul.f32.vlgmr.msrb.gmra.mxu1 %v256_v63 }
  0xd7   :  { %382 = vmatmul.f32.vlgmr.msrb.gmra.mxu2 %v256_v63  ;;  %402 = vmatmul.f32.vlgmr.msrb.gmra.mxu3 %v256_v63  ;;  %v2768_v63 = vld [vmem:[%s3883_s2 + $0x1e0] sm:$0xff] }
  0xd8   :  { %259 = vst [vmem:[#allocation4] sm:$0x3] %v258_v4  ;;  %v2773_v4 = vld [vmem:[%s3883_s2 + $0x1e8] sm:$0xff]  ;;  %792 = vmatpush.msrb.mxu0 %v2768_v63 }
  0xd9   :  { %812 = vmatpush.msrb.mxu1 %v2773_v4 }
 0x153   :  { %v363_v61 = vpop.f32.mrf.mxu1  ;;  %v343_v6 = vpop.f32.mrf.mxu0 }
 0x154   :  { %v410_v0 = vrot.slane %v363_v61, 6  ;;  %v2778_v61 = vld [vmem:[%s3883_s2 + $0x1f0] sm:$0xff] }
 0x155   :  { %832 = vmatpush.msrb.mxu2 %v2778_v61 }
 0x156   :  { %v413_v8 = vsel %vm179_vm0, %v343_v6, %v410_v0  ;;  %v2785_v0 = vld [vmem:[%s3883_s2 + $0x1f8] sm:$0xff]  ;;  %v2816_v6 = vld [vmem:[%s3883_s2 + $0x1a0] sm:$0xff] }
 0x157   :  { %3924 = vst [vmem:[#allocation11_spill] sm:$0xff] %v2785_v0  ;;  %852 = vmatpush.msrb.mxu3 %v2785_v0 }
 0x158   :  { %3928 = vst [vmem:[#allocation15_spill] sm:$0xff] %v2816_v6 }
 0x15a   :  { %v383_v1 = vpop.f32.mrf.mxu2  ;;  %v403_v2 = vpop.f32.mrf.mxu3 }
 0x15b   :  { %v411_v3 = vrot.slane %v383_v1, 4  ;;  %v412_v5 = vrot.slane %v403_v2, 2  ;;  %v2792_v1 = vld [vmem:[%s3883_s2 + $0x1c0] sm:$0xff]  ;;  %v2797_v2 = vld [vmem:[%s3883_s2 + $0x1c8] sm:$0xff] }
 0x15c   :  { %3925 = vst [vmem:[#allocation12_spill] sm:$0xff] %v2792_v1  ;;  %793 = vmatpush.msrb.mxu0 %v2792_v1  ;;  %813 = vmatpush.msrb.mxu1 %v2797_v2 }
 0x15d   :  { %v414_v9 = vsel %vm181_vm1, %v411_v3, %v412_v5  ;;  %v2802_v3 = vld [vmem:[%s3883_s2 + $0x1d0] sm:$0xff]  ;;  %v2809_v5 = vld [vmem:[%s3883_s2 + $0x1d8] sm:$0xff] }
 0x15e   :  { %v415_v10 = vsel %vm183_vm2, %v413_v8, %v414_v9  ;;  %3926 = vst [vmem:[#allocation13_spill] sm:$0xff] %v2802_v3  ;;  %833 = vmatpush.msrb.mxu2 %v2802_v3  ;;  %853 = vmatpush.msrb.mxu3 %v2809_v5  ;;  %v2826_v8 = vld [vmem:[%s3883_s2 + $0x1b0] sm:$0xff]  ;;  %v2833_v9 = vld [vmem:[%s3883_s2 + $0x1b8] sm:$0xff] }
 0x15f   :  { %v417_v11 = vadd.f32 %v1947_v7, %v415_v10  ;;  %3927 = vst [vmem:[#allocation14_spill] sm:$0xff] %v2809_v5  ;;  %v2821_v7 = vld [vmem:[%s3883_s2 + $0x1a8] sm:$0xff]  ;;  %794 = vmatpush.msrb.mxu0 %v2816_v6  ;;  %v2840_v10 = vld [vmem:[%s3883_s2 + $0x180] sm:$0xff] }
 0x160   :  { %3929 = vst [vmem:[#allocation16_spill] sm:$0xff] %v2826_v8  ;;  %814 = vmatpush.msrb.mxu1 %v2821_v7  ;;  %834 = vmatpush.msrb.mxu2 %v2826_v8 }
 0x161   :  { %v1948_v12 = vmul.f32 -1.442695, %v417_v11  ;;  %v438_v13 = vrot.slane %v417_v11, 2  ;;  %v462_v14 = vrot.slane %v417_v11, 6  ;;  %v459_v26 = vrot.slane %v417_v11, 4  ;;  %3930 = vst [vmem:[#allocation17_spill] sm:$0xff] %v2833_v9  ;;  %854 = vmatpush.msrb.mxu3 %v2833_v9  ;;  %795 = vmatpush.msrb.mxu0 %v2840_v10 }
 0x162   :  { %v2845_v11 = vld [vmem:[%s3883_s2 + $0x188] sm:$0xff] }
 0x163   :  { %2004 = vpow2.f32 %v1948_v12  ;;  %v1949_v15 = vmul.f32 -1.442695, %v438_v13  ;;  %v1950_v16 = vmul.f32 -1.442695, %v462_v14  ;;  %3931 = vst [vmem:[#allocation18_spill] sm:$0xff] %v2845_v11  ;;  %v2850_v12 = vld [vmem:[%s3883_s2 + $0x190] sm:$0xff]  ;;  %815 = vmatpush.msrb.mxu1 %v2845_v11 }
 0x164   :  { %v2857_v13 = vld [vmem:[%s3883_s2 + $0x198] sm:$0xff]  ;;  %835 = vmatpush.msrb.mxu2 %v2850_v12  ;;  %v2864_v14 = vld [vmem:[%s3883_s2 + $0x160] sm:$0xff] }
 0x165   :  { %2006 = vpow2.f32 %v1949_v15  ;;  %3932 = vst [vmem:[#allocation19_spill] sm:$0xff] %v2857_v13  ;;  %855 = vmatpush.msrb.mxu3 %v2857_v13  ;;  %v2869_v15 = vld [vmem:[%s3883_s2 + $0x168] sm:$0xff]  ;;  %796 = vmatpush.msrb.mxu0 %v2864_v14 }
 0x166   :  { %2008 = vpow2.f32 %v1950_v16  ;;  %3933 = vst [vmem:[#allocation20_spill] sm:$0xff] %v2864_v14  ;;  %v2874_v16 = vld [vmem:[%s3883_s2 + $0x170] sm:$0xff]  ;;  %816 = vmatpush.msrb.mxu1 %v2869_v15 }
 0x167   :  { %3934 = vst [vmem:[#allocation21_spill] sm:$0xff] %v2869_v15  ;;  %836 = vmatpush.msrb.mxu2 %v2874_v16 }
 0x169   :  { %v2005_v17 = vpop.eup %2004 }
 0x16a   :  { %v421_v18 = vadd.f32 1.0, %v2005_v17 }
 0x16b   :  { %v2007_v19 = vpop.eup %2006 }
 0x16c   :  { %v2009_v20 = vpop.eup %2008  ;;  %2010 = vrcp.f32 %v421_v18  ;;  %v443_v21 = vadd.f32 1.0, %v2007_v19  ;;  %v433_v30 = vand.u32 2147483648, %v421_v18  ;;  %v431_v34 = vand.u32 2147483647, %v421_v18  ;;  %v2888_v19 = vld [vmem:[%s3883_s2 + $0x140] sm:$0xff] }
 0x16d   :  { %v467_v22 = vadd.f32 1.0, %v2009_v20  ;;  %vm427_vm3 = vweird.f32 %v421_v18  ;;  %v2893_v20 = vld [vmem:[%s3883_s2 + $0x148] sm:$0xff]  ;;  %797 = vmatpush.msrb.mxu0 %v2888_v19 }
 0x16e   :  { %2012 = vrcp.f32 %v443_v21  ;;  %v455_v35 = vand.u32 2147483648, %v443_v21  ;;  %v453_v38 = vand.u32 2147483647, %v443_v21  ;;  %v434_v39 = vor.u32 1.1754944e-38, %v433_v30  ;;  %3935 = vst [vmem:[#allocation22_spill] sm:$0xff] %v2893_v20  ;;  %817 = vmatpush.msrb.mxu1 %v2893_v20 }
 0x16f   :  { %2014 = vrcp.f32 %v467_v22  ;;  %vm432_vm6 = vcmp.eq.f32.partialorder %v431_v34, 8.507059e+37  ;;  %vm449_vm7 = vweird.f32 %v443_v21  ;;  %v479_v54 = vand.u32 2147483648, %v467_v22 }
 0x170   :  { %2016 = vtanh.f32 %v459_v26  ;;  %v456_v44 = vor.u32 1.1754944e-38, %v455_v35  ;;  %vm454_vm9 = vcmp.eq.f32.partialorder %v453_v38, 8.507059e+37  ;;  %vm473_vm11 = vweird.f32 %v467_v22  ;;  %v2922_v26 = vld [vmem:[%s3883_s2 + $0x130] sm:$0xff] }
 0x171   :  { %v477_v55 = vand.u32 2147483647, %v467_v22  ;;  %v480_v57 = vor.u32 1.1754944e-38, %v479_v54  ;;  %v3024_v54 = vld [vmem:[%s3883_s2 + $0xb0] sm:$0xff] }
 0x172   :  { %v2011_v23 = vpop.eup %2010 }
 0x173   :  { %v423_v24 = vmul.f32 %v2011_v23, %v421_v18  ;;  %vm428_vm15 = vweird.f32 %v2011_v23  ;;  %vm478_vm13 = vcmp.eq.f32.partialorder %v477_v55, 8.507059e+37  ;;  %v2881_v18 = vld [vmem:[%s3883_s2 + $0x178] sm:$0xff] }
 0x174   :  { %v2013_v25 = vpop.eup %2012  ;;  %vm429_vm5 = vmor %vm427_vm3, %vm428_vm15  ;;  %856 = vmatpush.msrb.mxu3 %v2881_v18  ;;  %v3029_v55 = vld [vmem:[%s3883_s2 + $0xb8] sm:$0xff] }
 0x175   :  { %v2015_v27 = vpop.eup %2014  ;;  %v424_v28 = vsub.f32 1.0, %v423_v24  ;;  %v445_v29 = vmul.f32 %v2013_v25, %v443_v21  ;;  %vm450_vm4 = vweird.f32 %v2013_v25  ;;  %v2898_v21 = vld [vmem:[%s3883_s2 + $0x150] sm:$0xff]  ;;  %v2915_v24 = vld [vmem:[%s3883_s2 + $0x128] sm:$0xff] }
 0x176   :  { %v469_v31 = vmul.f32 %v2015_v27, %v467_v22  ;;  %vm451_vm8 = vmor %vm449_vm7, %vm450_vm4  ;;  %v2017_v46 = vpop.eup %2016  ;;  %vm474_vm10 = vweird.f32 %v2015_v27  ;;  %v2905_v22 = vld [vmem:[%s3883_s2 + $0x158] sm:$0xff]  ;;  %837 = vmatpush.msrb.mxu2 %v2898_v21  ;;  %818 = vmatpush.msrb.mxu1 %v2915_v24 }
 0x177   :  { %v446_v32 = vsub.f32 1.0, %v445_v29  ;;  %v425_v33 = vmul.f32 %v2011_v23, %v424_v28  ;;  %vm475_vm12 = vmor %vm473_vm11, %vm474_vm10  ;;  %857 = vmatpush.msrb.mxu3 %v2905_v22  ;;  %v2932_v28 = vld [vmem:[%s3883_s2 + $0x100] sm:$0xff] }
 0x178   :  { %v470_v40 = vsub.f32 1.0, %v469_v31  ;;  %v2939_v31 = vld [vmem:[%s3883_s2 + $0x108] sm:$0xff]  ;;  %838 = vmatpush.msrb.mxu2 %v2922_v26 }
 0x179   :  { %v426_v36 = vadd.f32 %v2011_v23, %v425_v33  ;;  %v447_v37 = vmul.f32 %v2013_v25, %v446_v32  ;;  %v2944_v32 = vld [vmem:[%s3883_s2 + $0x110] sm:$0xff]  ;;  %v2949_v33 = vld [vmem:[%s3883_s2 + $0x118] sm:$0xff]  ;;  %819 = vmatpush.msrb.mxu1 %v2939_v31 }
 0x17a   :  { %v471_v48 = vmul.f32 %v2015_v27, %v470_v40  ;;  %v2971_v40 = vld [vmem:[%s3883_s2 + $0xf0] sm:$0xff]  ;;  %839 = vmatpush.msrb.mxu2 %v2944_v32 }
 0x17b   :  { %v430_v41 = vsel %vm429_vm5, %v2011_v23, %v426_v36  ;;  %v448_v42 = vadd.f32 %v2013_v25, %v447_v37  ;;  %v2910_v23 = vld [vmem:[%s3883_s2 + $0x120] sm:$0xff]  ;;  %v2961_v37 = vld [vmem:[%s3883_s2 + $0xe8] sm:$0xff] }
 0x17c   :  { %v435_v43 = vsel %vm432_vm6, %v434_v39, %v430_v41  ;;  %v472_v52 = vadd.f32 %v2015_v27, %v471_v48  ;;  %798 = vmatpush.msrb.mxu0 %v2910_v23  ;;  %v2956_v36 = vld [vmem:[%s3883_s2 + $0xe0] sm:$0xff]  ;;  %v1952_v39 = vld [vmem:[%s3881_s0 + $0x10] sm:$0xff]  ;;  %v2976_v41 = vld [vmem:[%s3883_s2 + $0xf8] sm:$0xff]  ;;  %820 = vmatpush.msrb.mxu1 %v2961_v37 }
 0x17d   :  { %v452_v45 = vsel %vm451_vm8, %v2013_v25, %v448_v42  ;;  %v484_v50 = vmul.f32 %v2017_v46, %v435_v43  ;;  %v3003_v48 = vld [vmem:[%s3883_s2 + $0xd8] sm:$0xff]  ;;  %840 = vmatpush.msrb.mxu2 %v2971_v40 }
 0x17e   :  { %v457_v47 = vsel %vm454_vm9, %v456_v44, %v452_v45  ;;  %v476_v56 = vsel %vm475_vm12, %v2015_v27, %v472_v52  ;;  %v2927_v27 = vld [vmem:[%s3883_s2 + $0x138] sm:$0xff]  ;;  %799 = vmatpush.msrb.mxu0 %v2932_v28  ;;  %v2985_v44 = vld [vmem:[%s3883_s2 + $0xc0] sm:$0xff]  ;;  %v2990_v45 = vld [vmem:[%s3883_s2 + $0xc8] sm:$0xff] }
 0x17f   :  { %v483_v49 = vmul.f32 %v457_v47, %v2746_v53  ;;  %v481_v59 = vsel %vm478_vm13, %v480_v57, %v476_v56  ;;  %v1951_v53 = vld [vmem:[%s3882_s1 + $0x2] sm:$0x3]  ;;  %858 = vmatpush.msrb.mxu3 %v2927_v27  ;;  %v2998_v47 = vld [vmem:[%s3883_s2 + $0xd0] sm:$0xff]  ;;  %v3017_v52 = vld [vmem:[%s3883_s2 + $0xa8] sm:$0xff]  ;;  %821 = vmatpush.msrb.mxu1 %v2990_v45 }
 0x180   :  { %800 = vmatpush.msrb.mxu0 %v2956_v36  ;;  %841 = vmatpush.msrb.mxu2 %v2998_v47 }
 0x181   :  { %v2759_v51 = vadd.f32 %v484_v50, %v483_v49  ;;  %859 = vmatpush.msrb.mxu3 %v2949_v33  ;;  %v3012_v50 = vld [vmem:[%s3883_s2 + $0xa0] sm:$0xff]  ;;  %822 = vmatpush.msrb.mxu1 %v3017_v52 }
 0x182   :  { %801 = vmatpush.msrb.mxu0 %v2985_v44  ;;  %842 = vmatpush.msrb.mxu2 %v3024_v54 }
 0x183   :  { %2018 = vtanh.f32 %v2759_v51  ;;  %860 = vmatpush.msrb.mxu3 %v2976_v41 }
 0x184   :  { %802 = vmatpush.msrb.mxu0 %v3012_v50 }
 0x185   :  { %861 = vmatpush.msrb.mxu3 %v3003_v48 }
 0x187   :  { %862 = vmatpush.msrb.mxu3 %v3029_v55 }
 0x189   :  { %v2019_v58 = vpop.eup %2018 }
 0x18a   :  { %v487_v60 = vmul.f32 %v2019_v58, %v481_v59  ;;  %v3039_v59 = vld [vmem:[%s3883_s2 + $0x80] sm:$0xff] }
 0x18b   :  { %803 = vmatpush.msrb.mxu0 %v3039_v59 }
 0x18c   :  { %v490_v62 = vadd.f32 %v1951_v53, %v487_v60  ;;  %575 = vmatmul.f32.vlgmr.msra.gmra.mxu0 %v487_v60  ;;  %595 = vmatmul.f32.vlgmr.msra.gmra.mxu1 %v487_v60  ;;  %v3044_v53 = vld [vmem:[%s3883_s2 + $0x88] sm:$0xff] }
 0x18d   :  { %615 = vmatmul.f32.vlgmr.msra.gmra.mxu2 %v487_v60  ;;  %635 = vmatmul.f32.vlgmr.msra.gmra.mxu3 %v487_v60  ;;  %v3051_v60 = vld [vmem:[%s3883_s2 + $0x90] sm:$0xff] }
 0x18e   :  { %492 = vst [vmem:[#allocation4 + $0x2] sm:$0x3] %v490_v62  ;;  %v3056_v62 = vld [vmem:[%s3883_s2 + $0x98] sm:$0xff]  ;;  %823 = vmatpush.msrb.mxu1 %v3044_v53  ;;  %843 = vmatpush.msrb.mxu2 %v3051_v60 }
 0x18f   :  { %863 = vmatpush.msrb.mxu3 %v3056_v62 }
 0x209   :  { %v596_v17 = vpop.f32.mrf.mxu1  ;;  %v576_v38 = vpop.f32.mrf.mxu0 }
 0x20a   :  { %v643_v25 = vrot.slane %v596_v17, 6 }
 0x20c   :  { %v646_v42 = vsel %vm179_vm0, %v576_v38, %v643_v25  ;;  %v3087_v38 = vld [vmem:[%s3883_s2 + $0x40] sm:$0xff] }
 0x20d   :  { %3937 = vst [vmem:[#allocation24_spill] sm:$0xff] %v3087_v38 }
 0x210   :  { %v616_v29 = vpop.f32.mrf.mxu2  ;;  %v636_v30 = vpop.f32.mrf.mxu3 }
 0x211   :  { %v644_v34 = vrot.slane %v616_v29, 4  ;;  %v645_v35 = vrot.slane %v636_v30, 2  ;;  %v3063_v29 = vld [vmem:[%s3883_s2 + $0x60] sm:$0xff]  ;;  %v3068_v30 = vld [vmem:[%s3883_s2 + $0x68] sm:$0xff] }
 0x212   :  { %804 = vmatpush.msrb.mxu0 %v3063_v29  ;;  %824 = vmatpush.msrb.mxu1 %v3068_v30 }
 0x213   :  { %v647_v43 = vsel %vm181_vm1, %v644_v34, %v645_v35  ;;  %v3075_v34 = vld [vmem:[%s3883_s2 + $0x70] sm:$0xff]  ;;  %v3080_v35 = vld [vmem:[%s3883_s2 + $0x78] sm:$0xff] }
 0x214   :  { %v648_v46 = vsel %vm183_vm2, %v646_v42, %v647_v43  ;;  %3936 = vst [vmem:[#allocation23_spill] sm:$0xff] %v3080_v35  ;;  %v3099_v42 = vld [vmem:[%s3883_s2 + $0x50] sm:$0xff]  ;;  %v3104_v43 = vld [vmem:[%s3883_s2 + $0x58] sm:$0xff]  ;;  %844 = vmatpush.msrb.mxu2 %v3075_v34  ;;  %864 = vmatpush.msrb.mxu3 %v3080_v35 }
 0x215   :  { %v3005_v49 = vadd.f32 %v1952_v39, %v648_v46  ;;  %v3092_v39 = vld [vmem:[%s3883_s2 + $0x48] sm:$0xff]  ;;  %3939 = vst [vmem:[#allocation26_spill] sm:$0xff] %v3099_v42  ;;  %v3111_v46 = vld [vmem:[%s3883_s2 + $0x20] sm:$0xff]  ;;  %805 = vmatpush.msrb.mxu0 %v3087_v38 }
 0x216   :  { %3938 = vst [vmem:[#allocation25_spill] sm:$0xff] %v3092_v39  ;;  %825 = vmatpush.msrb.mxu1 %v3092_v39  ;;  %845 = vmatpush.msrb.mxu2 %v3099_v42  ;;  %v3140_v39 = vld [vmem:[%s3883_s2 + $0x8] sm:$0xff]  ;;  %v3154_v42 = vld [vmem:[%s3883_s2 + $0x18] sm:$0xff] }
 0x217   :  { %v1953_v56 = vmul.f32 -1.442695, %v3005_v49  ;;  %v671_v57 = vrot.slane %v3005_v49, 2  ;;  %v695_v58 = vrot.slane %v3005_v49, 6  ;;  %3940 = vst [vmem:[#allocation27_spill] sm:$0xff] %v3104_v43  ;;  %865 = vmatpush.msrb.mxu3 %v3104_v43  ;;  %806 = vmatpush.msrb.mxu0 %v3111_v46  ;;  %v3149_v43 = vld [vmem:[%s3883_s2 + $0x10] sm:$0xff] }
 0x218   :  { %3941 = vst [vmem:[#allocation28_spill] sm:$0xff] %v3111_v46 }
 0x219   :  { %2020 = vpow2.f32 %v1953_v56  ;;  %v1954_v17 = vmul.f32 -1.442695, %v671_v57  ;;  %v1955_v25 = vmul.f32 -1.442695, %v695_v58  ;;  %v3116_v56 = vld [vmem:[%s3883_s2 + $0x28] sm:$0xff]  ;;  %v3123_v57 = vld [vmem:[%s3883_s2 + $0x30] sm:$0xff] }
 0x21a   :  { %3942 = vst [vmem:[#allocation29_spill] sm:$0xff] %v3116_v56  ;;  %v3128_v58 = vld [vmem:[%s3883_s2 + $0x38] sm:$0xff]  ;;  %826 = vmatpush.msrb.mxu1 %v3116_v56  ;;  %846 = vmatpush.msrb.mxu2 %v3123_v57 }
 0x21b   :  { %2022 = vpow2.f32 %v1954_v17  ;;  %866 = vmatpush.msrb.mxu3 %v3128_v58 }
 0x21c   :  { %2024 = vpow2.f32 %v1955_v25  ;;  %v3135_v25 = vld [vmem:[%s3883_s2] sm:$0xff]  ;;  %827 = vmatpush.msrb.mxu1 %v3140_v39  ;;  %847 = vmatpush.msrb.mxu2 %v3149_v43 }
 0x21d   :  { %807 = vmatpush.msrb.mxu0 %v3135_v25  ;;  %867 = vmatpush.msrb.mxu3 %v3154_v42 }
 0x21e   :  { %1045 = vmatpush.msra.mxu1 %v2773_v4  ;;  %1065 = vmatpush.msra.mxu2 %v2778_v61 }
 0x21f   :  { %v2021_v17 = vpop.eup %2020  ;;  %1025 = vmatpush.msra.mxu0 %v2768_v63  ;;  %1085 = vmatpush.msra.mxu3 %v2785_v0 }
 0x220   :  { %v3142_v38 = vadd.f32 1.0, %v2021_v17  ;;  %1046 = vmatpush.msra.mxu1 %v2797_v2  ;;  %1066 = vmatpush.msra.mxu2 %v2802_v3 }
 0x221   :  { %v2023_v35 = vpop.eup %2022  ;;  %1026 = vmatpush.msra.mxu0 %v2792_v1  ;;  %1086 = vmatpush.msra.mxu3 %v2809_v5  ;;  %v692_v1 = vrot.slane %v3005_v49, 4 }
 0x222   :  { %v2025_v17 = vpop.eup %2024  ;;  %2026 = vrcp.f32 %v3142_v38  ;;  %v3159_v46 = vadd.f32 1.0, %v2023_v35  ;;  %1047 = vmatpush.msra.mxu1 %v2821_v7  ;;  %1067 = vmatpush.msra.mxu2 %v2826_v8  ;;  %v666_v8 = vand.u32 2147483648, %v3142_v38  ;;  %vm660_vm15 = vweird.f32 %v3142_v38 }
 0x223   :  { %v3163_v56 = vadd.f32 1.0, %v2025_v17  ;;  %1027 = vmatpush.msra.mxu0 %v2816_v6  ;;  %1087 = vmatpush.msra.mxu3 %v2833_v9 }
 0x224   :  { %2028 = vrcp.f32 %v3159_v46  ;;  %1048 = vmatpush.msra.mxu1 %v2845_v11  ;;  %1068 = vmatpush.msra.mxu2 %v2850_v12  ;;  %vm682_vm6 = vweird.f32 %v3159_v46 }
 0x225   :  { %2030 = vrcp.f32 %v3163_v56  ;;  %1028 = vmatpush.msra.mxu0 %v2840_v10  ;;  %1088 = vmatpush.msra.mxu3 %v2857_v13  ;;  %v688_v13 = vand.u32 2147483648, %v3159_v46  ;;  %vm706_vm10 = vweird.f32 %v3163_v56 }
 0x226   :  { %1049 = vmatpush.msra.mxu1 %v2869_v15  ;;  %1069 = vmatpush.msra.mxu2 %v2874_v16  ;;  %2032 = vtanh.f32 %v692_v1  ;;  %v667_v1 = vor.u32 1.1754944e-38, %v666_v8 }
 0x227   :  { %1029 = vmatpush.msra.mxu0 %v2864_v14  ;;  %1089 = vmatpush.msra.mxu3 %v2881_v18 }
 0x228   :  { %v2027_v35 = vpop.eup %2026  ;;  %1050 = vmatpush.msra.mxu1 %v2893_v20  ;;  %1070 = vmatpush.msra.mxu2 %v2898_v21 }
 0x229   :  { %v656_v17 = vmul.f32 %v2027_v35, %v3142_v38  ;;  %vm661_vm14 = vweird.f32 %v2027_v35  ;;  %1030 = vmatpush.msra.mxu0 %v2888_v19  ;;  %1090 = vmatpush.msra.mxu3 %v2905_v22 }
 0x22a   :  { %v2029_v0 = vpop.eup %2028  ;;  %vm662_vm4 = vmor %vm660_vm15, %vm661_vm14  ;;  %1051 = vmatpush.msra.mxu1 %v2915_v24  ;;  %1071 = vmatpush.msra.mxu2 %v2922_v26 }
 0x22b   :  { %v3185_v3 = vpop.eup %2030  ;;  %v657_v5 = vsub.f32 1.0, %v656_v17  ;;  %v678_v6 = vmul.f32 %v2029_v0, %v3159_v46  ;;  %v664_v17 = vand.u32 2147483647, %v3142_v38  ;;  %vm683_vm3 = vweird.f32 %v2029_v0  ;;  %1031 = vmatpush.msra.mxu0 %v2910_v23  ;;  %1091 = vmatpush.msra.mxu3 %v2927_v27 }
 0x22c   :  { %v702_v9 = vmul.f32 %v3185_v3, %v3163_v56  ;;  %vm684_vm7 = vmor %vm682_vm6, %vm683_vm3  ;;  %1052 = vmatpush.msra.mxu1 %v2939_v31  ;;  %1072 = vmatpush.msra.mxu2 %v2944_v32  ;;  %vm707_vm9 = vweird.f32 %v3185_v3 }
 0x22d   :  { %v679_v49 = vsub.f32 1.0, %v678_v6  ;;  %v658_v11 = vmul.f32 %v2027_v35, %v657_v5  ;;  %v686_v5 = vand.u32 2147483647, %v3159_v46  ;;  %vm665_vm5 = vcmp.eq.f32.partialorder %v664_v17, 8.507059e+37  ;;  %1032 = vmatpush.msra.mxu0 %v2932_v28  ;;  %1092 = vmatpush.msra.mxu3 %v2949_v33  ;;  %vm708_vm11 = vmor %vm706_vm10, %vm707_vm9 }
 0x22e   :  { %v703_v6 = vsub.f32 1.0, %v702_v9  ;;  %v2033_v9 = vpop.eup %2032  ;;  %1053 = vmatpush.msra.mxu1 %v2961_v37  ;;  %1073 = vmatpush.msra.mxu2 %v2971_v40 }
 0x22f   :  { %v659_v14 = vadd.f32 %v2027_v35, %v658_v11  ;;  %v680_v15 = vmul.f32 %v2029_v0, %v679_v49  ;;  %v689_v49 = vor.u32 1.1754944e-38, %v688_v13  ;;  %vm687_vm8 = vcmp.eq.f32.partialorder %v686_v5, 8.507059e+37  ;;  %1033 = vmatpush.msra.mxu0 %v2956_v36  ;;  %1093 = vmatpush.msra.mxu3 %v2976_v41 }
 0x230   :  { %1054 = vmatpush.msra.mxu1 %v2990_v45  ;;  %1074 = vmatpush.msra.mxu2 %v2998_v47 }
 0x231   :  { %v663_v38 = vsel %vm662_vm4, %v2027_v35, %v659_v14  ;;  %v681_v20 = vadd.f32 %v2029_v0, %v680_v15  ;;  %v704_v15 = vmul.f32 %v3185_v3, %v703_v6  ;;  %1034 = vmatpush.msra.mxu0 %v2985_v44  ;;  %1094 = vmatpush.msra.mxu3 %v3003_v48  ;;  %v710_v35 = vand.u32 2147483647, %v3163_v56  ;;  %v3945_v6 = vld [vmem:[#allocation25_spill] sm:$0xff] }
 0x232   :  { %v668_v11 = vsel %vm665_vm5, %v667_v1, %v663_v38  ;;  %1055 = vmatpush.msra.mxu1 %v3017_v52  ;;  %1075 = vmatpush.msra.mxu2 %v3024_v54  ;;  %v3943_v1 = vld [vmem:[#allocation23_spill] sm:$0xff] }
 0x233   :  { %v685_v8 = vsel %vm684_vm7, %v2029_v0, %v681_v20  ;;  %v717_v46 = vmul.f32 %v2033_v9, %v668_v11  ;;  %v705_v20 = vadd.f32 %v3185_v3, %v704_v15  ;;  %1035 = vmatpush.msra.mxu0 %v3012_v50  ;;  %1095 = vmatpush.msra.mxu3 %v3029_v55  ;;  %vm711_vm12 = vcmp.eq.f32.partialorder %v710_v35, 8.507059e+37  ;;  %v3949_v15 = vld [vmem:[#allocation29_spill] sm:$0xff]  ;;  %v3953_v35 = vld [vmem:[#allocation14_spill] sm:$0xff] }
 0x234   :  { %v690_v14 = vsel %vm687_vm8, %v689_v49, %v685_v8  ;;  %1056 = vmatpush.msra.mxu1 %v3044_v53  ;;  %1076 = vmatpush.msra.mxu2 %v3051_v60  ;;  %v3946_v49 = vld [vmem:[#allocation26_spill] sm:$0xff]  ;;  %v3947_v8 = vld [vmem:[#allocation27_spill] sm:$0xff] }
 0x235   :  { %v716_v13 = vmul.f32 %v690_v14, %v2759_v51  ;;  %v712_v51 = vand.u32 2147483648, %v3163_v56  ;;  %1036 = vmatpush.msra.mxu0 %v3039_v59  ;;  %1096 = vmatpush.msra.mxu3 %v3056_v62  ;;  %v709_v17 = vsel %vm708_vm11, %v3185_v3, %v705_v20  ;;  %v3944_v56 = vld [vmem:[#allocation24_spill] sm:$0xff] }
 0x236   :  { %1057 = vmatpush.msra.mxu1 %v3068_v30  ;;  %1077 = vmatpush.msra.mxu2 %v3075_v34  ;;  %v1956_v3 = vld [vmem:[%s3882_s1 + $0x4] sm:$0x3] }
 0x237   :  { %v3224_v0 = vadd.f32 %v717_v46, %v716_v13  ;;  %1037 = vmatpush.msra.mxu0 %v3063_v29  ;;  %v713_v5 = vor.u32 1.1754944e-38, %v712_v51  ;;  %1097 = vmatpush.msra.mxu3 %v3943_v1  ;;  %v3948_v14 = vld [vmem:[#allocation28_spill] sm:$0xff]  ;;  %v3950_v46 = vld [vmem:[#allocation11_spill] sm:$0xff]  ;;  %v3952_v51 = vld [vmem:[#allocation13_spill] sm:$0xff] }
 0x238   :  { %1058 = vmatpush.msra.mxu1 %v3945_v6  ;;  %1078 = vmatpush.msra.mxu2 %v3946_v49  ;;  %v3951_v20 = vld [vmem:[#allocation12_spill] sm:$0xff] }
 0x239   :  { %2034 = vtanh.f32 %v3224_v0  ;;  %1038 = vmatpush.msra.mxu0 %v3944_v56  ;;  %v714_v11 = vsel %vm711_vm12, %v713_v5, %v709_v17  ;;  %1098 = vmatpush.msra.mxu3 %v3947_v8  ;;  %v3954_v17 = vld [vmem:[#allocation15_spill] sm:$0xff]  ;;  %v3955_v5 = vld [vmem:[#allocation16_spill] sm:$0xff] }
 0x23a   :  { %1059 = vmatpush.msra.mxu1 %v3949_v15  ;;  %1079 = vmatpush.msra.mxu2 %v3123_v57 }
 0x23b   :  { %1039 = vmatpush.msra.mxu0 %v3948_v14  ;;  %1099 = vmatpush.msra.mxu3 %v3128_v58 }
 0x23c   :  { %1060 = vmatpush.msra.mxu1 %v3140_v39  ;;  %1080 = vmatpush.msra.mxu2 %v3149_v43 }
 0x23d   :  { %1040 = vmatpush.msra.mxu0 %v3135_v25  ;;  %1100 = vmatpush.msra.mxu3 %v3154_v42 }
 0x23f   :  { %v2035_v38 = vpop.eup %2034 }
 0x240   :  { %v720_v9 = vmul.f32 %v2035_v38, %v714_v11  ;;  %v3960_v38 = vld [vmem:[#allocation21_spill] sm:$0xff] }
 0x242   :  { %v723_v13 = vadd.f32 %v1956_v3, %v720_v9  ;;  %808 = vmatmul.f32.vlgmr.msrb.gmra.mxu0 %v720_v9  ;;  %828 = vmatmul.f32.vlgmr.msrb.gmra.mxu1 %v720_v9 }
 0x243   :  { %848 = vmatmul.f32.vlgmr.msrb.gmra.mxu2 %v720_v9  ;;  %868 = vmatmul.f32.vlgmr.msrb.gmra.mxu3 %v720_v9 }
 0x244   :  { %725 = vst [vmem:[#allocation4 + $0x4] sm:$0x3] %v723_v13  ;;  %1258 = vmatpush.msrb.mxu0 %v2768_v63  ;;  %1278 = vmatpush.msrb.mxu1 %v2773_v4  ;;  %v3956_v63 = vld [vmem:[#allocation17_spill] sm:$0xff]  ;;  %v3957_v4 = vld [vmem:[#allocation18_spill] sm:$0xff] }
 0x245   :  { %1298 = vmatpush.msrb.mxu2 %v2778_v61  ;;  %1318 = vmatpush.msrb.mxu3 %v3950_v46  ;;  %v3958_v61 = vld [vmem:[#allocation19_spill] sm:$0xff] }
 0x246   :  { %1259 = vmatpush.msrb.mxu0 %v3951_v20  ;;  %1279 = vmatpush.msrb.mxu1 %v2797_v2  ;;  %v3959_v2 = vld [vmem:[#allocation20_spill] sm:$0xff] }
 0x247   :  { %1299 = vmatpush.msrb.mxu2 %v3952_v51  ;;  %1319 = vmatpush.msrb.mxu3 %v3953_v35 }
 0x248   :  { %1260 = vmatpush.msrb.mxu0 %v3954_v17  ;;  %1280 = vmatpush.msrb.mxu1 %v2821_v7  ;;  %v3961_v7 = vld [vmem:[#allocation22_spill] sm:$0xff] }
 0x249   :  { %1300 = vmatpush.msrb.mxu2 %v3955_v5  ;;  %1320 = vmatpush.msrb.mxu3 %v3956_v63 }
 0x24a   :  { %1261 = vmatpush.msrb.mxu0 %v2840_v10  ;;  %1281 = vmatpush.msrb.mxu1 %v3957_v4 }
 0x24b   :  { %1301 = vmatpush.msrb.mxu2 %v2850_v12  ;;  %1321 = vmatpush.msrb.mxu3 %v3958_v61 }
 0x24c   :  { %1262 = vmatpush.msrb.mxu0 %v3959_v2  ;;  %1282 = vmatpush.msrb.mxu1 %v3960_v38 }
 0x24d   :  { %1302 = vmatpush.msrb.mxu2 %v2874_v16  ;;  %1322 = vmatpush.msrb.mxu3 %v2881_v18 }
 0x24e   :  { %1263 = vmatpush.msrb.mxu0 %v2888_v19  ;;  %1283 = vmatpush.msrb.mxu1 %v3961_v7 }
 0x24f   :  { %1303 = vmatpush.msrb.mxu2 %v2898_v21  ;;  %1323 = vmatpush.msrb.mxu3 %v2905_v22 }
 0x250   :  { %1264 = vmatpush.msrb.mxu0 %v2910_v23  ;;  %1284 = vmatpush.msrb.mxu1 %v2915_v24  ;;  %v1957_v23 = vld [vmem:[%s3881_s0 + $0x18] sm:$0xff] }
 0x251   :  { %1304 = vmatpush.msrb.mxu2 %v2922_v26  ;;  %1324 = vmatpush.msrb.mxu3 %v2927_v27 }
 0x252   :  { %1265 = vmatpush.msrb.mxu0 %v2932_v28  ;;  %1285 = vmatpush.msrb.mxu1 %v2939_v31 }
 0x253   :  { %1305 = vmatpush.msrb.mxu2 %v2944_v32  ;;  %1325 = vmatpush.msrb.mxu3 %v2949_v33 }
 0x254   :  { %1266 = vmatpush.msrb.mxu0 %v2956_v36  ;;  %1286 = vmatpush.msrb.mxu1 %v2961_v37 }
 0x255   :  { %1306 = vmatpush.msrb.mxu2 %v2971_v40  ;;  %1326 = vmatpush.msrb.mxu3 %v2976_v41 }
 0x256   :  { %1267 = vmatpush.msrb.mxu0 %v2985_v44  ;;  %1287 = vmatpush.msrb.mxu1 %v2990_v45 }
 0x257   :  { %1307 = vmatpush.msrb.mxu2 %v2998_v47  ;;  %1327 = vmatpush.msrb.mxu3 %v3003_v48 }
 0x258   :  { %1268 = vmatpush.msrb.mxu0 %v3012_v50  ;;  %1288 = vmatpush.msrb.mxu1 %v3017_v52 }
 0x259   :  { %1308 = vmatpush.msrb.mxu2 %v3024_v54  ;;  %1328 = vmatpush.msrb.mxu3 %v3029_v55 }
 0x25a   :  { %1269 = vmatpush.msrb.mxu0 %v3039_v59  ;;  %1289 = vmatpush.msrb.mxu1 %v3044_v53 }
 0x25b   :  { %1309 = vmatpush.msrb.mxu2 %v3051_v60  ;;  %1329 = vmatpush.msrb.mxu3 %v3056_v62 }
 0x25c   :  { %1270 = vmatpush.msrb.mxu0 %v3063_v29  ;;  %1290 = vmatpush.msrb.mxu1 %v3068_v30 }
 0x25d   :  { %1310 = vmatpush.msrb.mxu2 %v3075_v34  ;;  %1330 = vmatpush.msrb.mxu3 %v3943_v1 }
 0x25e   :  { %1271 = vmatpush.msrb.mxu0 %v3944_v56  ;;  %1291 = vmatpush.msrb.mxu1 %v3945_v6 }
 0x25f   :  { %1311 = vmatpush.msrb.mxu2 %v3946_v49  ;;  %1331 = vmatpush.msrb.mxu3 %v3947_v8 }
 0x260   :  { %1272 = vmatpush.msrb.mxu0 %v3948_v14  ;;  %1292 = vmatpush.msrb.mxu1 %v3949_v15 }
 0x261   :  { %1312 = vmatpush.msrb.mxu2 %v3123_v57  ;;  %1332 = vmatpush.msrb.mxu3 %v3128_v58 }
 0x262   :  { %1273 = vmatpush.msrb.mxu0 %v3135_v25  ;;  %1293 = vmatpush.msrb.mxu1 %v3140_v39 }
 0x263   :  { %1313 = vmatpush.msrb.mxu2 %v3149_v43  ;;  %1333 = vmatpush.msrb.mxu3 %v3154_v42 }
 0x2bf   :  { %v829_v10 = vpop.f32.mrf.mxu1  ;;  %v809_v22 = vpop.f32.mrf.mxu0 }
 0x2c0   :  { %v876_v12 = vrot.slane %v829_v10, 6 }
 0x2c2   :  { %v879_v24 = vsel %vm179_vm0, %v809_v22, %v876_v12 }
 0x2c6   :  { %v849_v16 = vpop.f32.mrf.mxu2  ;;  %v869_v18 = vpop.f32.mrf.mxu3 }
 0x2c7   :  { %v877_v19 = vrot.slane %v849_v16, 4  ;;  %v878_v21 = vrot.slane %v869_v18, 2 }
 0x2c9   :  { %v880_v26 = vsel %vm181_vm1, %v877_v19, %v878_v21  ;;  %v1962_v21 = vld [vmem:[%s3881_s0 + $0x20] sm:$0xff] }
 0x2ca   :  { %v881_v27 = vsel %vm183_vm2, %v879_v24, %v880_v26 }
 0x2cb   :  { %v883_v28 = vadd.f32 %v1957_v23, %v881_v27 }
 0x2cd   :  { %v1958_v31 = vmul.f32 -1.442695, %v883_v28  ;;  %v904_v32 = vrot.slane %v883_v28, 2  ;;  %v928_v33 = vrot.slane %v883_v28, 6  ;;  %v925_v55 = vrot.slane %v883_v28, 4 }
 0x2cf   :  { %2036 = vpow2.f32 %v1958_v31  ;;  %v1959_v36 = vmul.f32 -1.442695, %v904_v32  ;;  %v1960_v37 = vmul.f32 -1.442695, %v928_v33 }
 0x2d1   :  { %2038 = vpow2.f32 %v1959_v36 }
 0x2d2   :  { %2040 = vpow2.f32 %v1960_v37 }
 0x2d5   :  { %v2037_v40 = vpop.eup %2036 }
 0x2d6   :  { %v887_v41 = vadd.f32 1.0, %v2037_v40 }
 0x2d7   :  { %v2039_v44 = vpop.eup %2038 }
 0x2d8   :  { %v2041_v45 = vpop.eup %2040  ;;  %2042 = vrcp.f32 %v887_v41  ;;  %v909_v47 = vadd.f32 1.0, %v2039_v44  ;;  %v899_v62 = vand.u32 2147483648, %v887_v41  ;;  %v897_v39 = vand.u32 2147483647, %v887_v41 }
 0x2d9   :  { %v933_v48 = vadd.f32 1.0, %v2041_v45  ;;  %vm893_vm14 = vweird.f32 %v887_v41 }
 0x2da   :  { %2044 = vrcp.f32 %v909_v47  ;;  %v921_v42 = vand.u32 2147483648, %v909_v47  ;;  %v919_v58 = vand.u32 2147483647, %v909_v47  ;;  %v900_v25 = vor.u32 1.1754944e-38, %v899_v62 }
 0x2db   :  { %2046 = vrcp.f32 %v933_v48  ;;  %vm898_vm4 = vcmp.eq.f32.partialorder %v897_v39, 8.507059e+37  ;;  %vm915_vm5 = vweird.f32 %v909_v47  ;;  %v945_v51 = vand.u32 2147483648, %v933_v48 }
 0x2dc   :  { %2048 = vtanh.f32 %v925_v55  ;;  %v922_v3 = vor.u32 1.1754944e-38, %v921_v42  ;;  %vm920_vm7 = vcmp.eq.f32.partialorder %v919_v58, 8.507059e+37  ;;  %vm939_vm9 = vweird.f32 %v933_v48 }
 0x2dd   :  { %v943_v35 = vand.u32 2147483647, %v933_v48  ;;  %v946_v5 = vor.u32 1.1754944e-38, %v945_v51 }
 0x2de   :  { %v2043_v50 = vpop.eup %2042 }
 0x2df   :  { %v889_v52 = vmul.f32 %v2043_v50, %v887_v41  ;;  %vm894_vm13 = vweird.f32 %v2043_v50  ;;  %vm944_vm11 = vcmp.eq.f32.partialorder %v943_v35, 8.507059e+37 }
 0x2e0   :  { %v2045_v54 = vpop.eup %2044  ;;  %vm895_vm3 = vmor %vm893_vm14, %vm894_vm13 }
 0x2e1   :  { %v2047_v59 = vpop.eup %2046  ;;  %v890_v53 = vsub.f32 1.0, %v889_v52  ;;  %v911_v60 = vmul.f32 %v2045_v54, %v909_v47  ;;  %vm916_vm15 = vweird.f32 %v2045_v54 }
 0x2e2   :  { %v935_v29 = vmul.f32 %v2047_v59, %v933_v48  ;;  %vm917_vm6 = vmor %vm915_vm5, %vm916_vm15  ;;  %v2049_v8 = vpop.eup %2048  ;;  %vm940_vm8 = vweird.f32 %v2047_v59 }
 0x2e3   :  { %v912_v30 = vsub.f32 1.0, %v911_v60  ;;  %v891_v34 = vmul.f32 %v2043_v50, %v890_v53  ;;  %vm941_vm10 = vmor %vm939_vm9, %vm940_vm8 }
 0x2e4   :  { %v936_v1 = vsub.f32 1.0, %v935_v29 }
 0x2e5   :  { %v892_v43 = vadd.f32 %v2043_v50, %v891_v34  ;;  %v913_v57 = vmul.f32 %v2045_v54, %v912_v30 }
 0x2e6   :  { %v937_v14 = vmul.f32 %v2047_v59, %v936_v1 }
 0x2e7   :  { %v896_v56 = vsel %vm895_vm3, %v2043_v50, %v892_v43  ;;  %v914_v6 = vadd.f32 %v2045_v54, %v913_v57 }
 0x2e8   :  { %v901_v11 = vsel %vm898_vm4, %v900_v25, %v896_v56  ;;  %v938_v20 = vadd.f32 %v2047_v59, %v937_v14 }
 0x2e9   :  { %v918_v49 = vsel %vm917_vm6, %v2045_v54, %v914_v6  ;;  %v950_v13 = vmul.f32 %v2049_v8, %v901_v11 }
 0x2ea   :  { %v923_v9 = vsel %vm920_vm7, %v922_v3, %v918_v49  ;;  %v942_v17 = vsel %vm941_vm10, %v2047_v59, %v938_v20 }
 0x2eb   :  { %v949_v15 = vmul.f32 %v923_v9, %v3224_v0  ;;  %v947_v4 = vsel %vm944_vm11, %v946_v5, %v942_v17  ;;  %v1961_v0 = vld [vmem:[%s3882_s1 + $0x6] sm:$0x3] }
 0x2ed   :  { %v3333_v46 = vadd.f32 %v950_v13, %v949_v15 }
 0x2ef   :  { %2050 = vtanh.f32 %v3333_v46 }
 0x2f5   :  { %v2051_v63 = vpop.eup %2050 }
 0x2f6   :  { %v953_v61 = vmul.f32 %v2051_v63, %v947_v4 }
 0x2f8   :  { %v956_v2 = vadd.f32 %v1961_v0, %v953_v61  ;;  %1041 = vmatmul.f32.vlgmr.msra.gmra.mxu0 %v953_v61  ;;  %1061 = vmatmul.f32.vlgmr.msra.gmra.mxu1 %v953_v61 }
 0x2f9   :  { %1081 = vmatmul.f32.vlgmr.msra.gmra.mxu2 %v953_v61  ;;  %1101 = vmatmul.f32.vlgmr.msra.gmra.mxu3 %v953_v61  ;;  %v3355_v61 = vld [vmem:[%s3883_s2 + $0x1e0] sm:$0xff] }
 0x2fa   :  { %958 = vst [vmem:[#allocation4 + $0x6] sm:$0x3] %v956_v2  ;;  %v3360_v2 = vld [vmem:[%s3883_s2 + $0x1e8] sm:$0xff]  ;;  %1491 = vmatpush.msra.mxu0 %v3355_v61 }
 0x2fb   :  { %1511 = vmatpush.msra.mxu1 %v3360_v2 }
 0x375   :  { %v1062_v38 = vpop.f32.mrf.mxu1  ;;  %v1042_v19 = vpop.f32.mrf.mxu0 }
 0x376   :  { %v1109_v7 = vrot.slane %v1062_v38, 6  ;;  %v3365_v38 = vld [vmem:[%s3883_s2 + $0x1f0] sm:$0xff] }
 0x377   :  { %1531 = vmatpush.msra.mxu2 %v3365_v38 }
 0x378   :  { %v1112_v22 = vsel %vm179_vm0, %v1042_v19, %v1109_v7  ;;  %v3372_v7 = vld [vmem:[%s3883_s2 + $0x1f8] sm:$0xff]  ;;  %v3403_v19 = vld [vmem:[%s3883_s2 + $0x1a0] sm:$0xff] }
 0x379   :  { %1551 = vmatpush.msra.mxu3 %v3372_v7 }
 0x37c   :  { %v1082_v10 = vpop.f32.mrf.mxu2  ;;  %v1102_v12 = vpop.f32.mrf.mxu3 }
 0x37d   :  { %v1110_v16 = vrot.slane %v1082_v10, 4  ;;  %v1111_v18 = vrot.slane %v1102_v12, 2  ;;  %v3379_v10 = vld [vmem:[%s3883_s2 + $0x1c0] sm:$0xff]  ;;  %v3384_v12 = vld [vmem:[%s3883_s2 + $0x1c8] sm:$0xff] }
 0x37e   :  { %1492 = vmatpush.msra.mxu0 %v3379_v10  ;;  %1512 = vmatpush.msra.mxu1 %v3384_v12 }
 0x37f   :  { %v1113_v23 = vsel %vm181_vm1, %v1110_v16, %v1111_v18  ;;  %v3389_v16 = vld [vmem:[%s3883_s2 + $0x1d0] sm:$0xff]  ;;  %v3396_v18 = vld [vmem:[%s3883_s2 + $0x1d8] sm:$0xff] }
 0x380   :  { %v1114_v24 = vsel %vm183_vm2, %v1112_v22, %v1113_v23  ;;  %1532 = vmatpush.msra.mxu2 %v3389_v16  ;;  %1552 = vmatpush.msra.mxu3 %v3396_v18  ;;  %v3413_v22 = vld [vmem:[%s3883_s2 + $0x1b0] sm:$0xff]  ;;  %v3420_v23 = vld [vmem:[%s3883_s2 + $0x1b8] sm:$0xff] }
 0x381   :  { %v1116_v26 = vadd.f32 %v1962_v21, %v1114_v24  ;;  %v3408_v21 = vld [vmem:[%s3883_s2 + $0x1a8] sm:$0xff]  ;;  %1493 = vmatpush.msra.mxu0 %v3403_v19  ;;  %v3427_v24 = vld [vmem:[%s3883_s2 + $0x180] sm:$0xff] }
 0x382   :  { %1513 = vmatpush.msra.mxu1 %v3408_v21  ;;  %1533 = vmatpush.msra.mxu2 %v3413_v22 }
 0x383   :  { %v1963_v27 = vmul.f32 -1.442695, %v1116_v26  ;;  %v1137_v28 = vrot.slane %v1116_v26, 2  ;;  %v1161_v31 = vrot.slane %v1116_v26, 6  ;;  %v1158_v52 = vrot.slane %v1116_v26, 4  ;;  %1553 = vmatpush.msra.mxu3 %v3420_v23  ;;  %v3432_v26 = vld [vmem:[%s3883_s2 + $0x188] sm:$0xff]  ;;  %1494 = vmatpush.msra.mxu0 %v3427_v24 }
 0x384   :  { %1514 = vmatpush.msra.mxu1 %v3432_v26 }
 0x385   :  { %2052 = vpow2.f32 %v1963_v27  ;;  %v1964_v32 = vmul.f32 -1.442695, %v1137_v28  ;;  %v1965_v33 = vmul.f32 -1.442695, %v1161_v31  ;;  %v3437_v27 = vld [vmem:[%s3883_s2 + $0x190] sm:$0xff]  ;;  %v3444_v28 = vld [vmem:[%s3883_s2 + $0x198] sm:$0xff] }
 0x386   :  { %1534 = vmatpush.msra.mxu2 %v3437_v27  ;;  %1554 = vmatpush.msra.mxu3 %v3444_v28  ;;  %v3451_v31 = vld [vmem:[%s3883_s2 + $0x160] sm:$0xff] }
 0x387   :  { %2054 = vpow2.f32 %v1964_v32  ;;  %v3456_v32 = vld [vmem:[%s3883_s2 + $0x168] sm:$0xff]  ;;  %1495 = vmatpush.msra.mxu0 %v3451_v31 }
 0x388   :  { %2056 = vpow2.f32 %v1965_v33  ;;  %v3461_v33 = vld [vmem:[%s3883_s2 + $0x170] sm:$0xff]  ;;  %1515 = vmatpush.msra.mxu1 %v3456_v32 }
 0x389   :  { %1535 = vmatpush.msra.mxu2 %v3461_v33 }
 0x38b   :  { %v2053_v36 = vpop.eup %2052 }
 0x38c   :  { %v1120_v37 = vadd.f32 1.0, %v2053_v36 }
 0x38d   :  { %v2055_v40 = vpop.eup %2054 }
 0x38e   :  { %v2057_v41 = vpop.eup %2056  ;;  %2058 = vrcp.f32 %v1120_v37  ;;  %v1142_v44 = vadd.f32 1.0, %v2055_v40  ;;  %v1132_v53 = vand.u32 2147483648, %v1120_v37  ;;  %v1130_v30 = vand.u32 2147483647, %v1120_v37  ;;  %v3475_v40 = vld [vmem:[%s3883_s2 + $0x140] sm:$0xff] }
 0x38f   :  { %v1166_v45 = vadd.f32 1.0, %v2057_v41  ;;  %vm1126_vm13 = vweird.f32 %v1120_v37  ;;  %v3480_v41 = vld [vmem:[%s3883_s2 + $0x148] sm:$0xff]  ;;  %1496 = vmatpush.msra.mxu0 %v3475_v40 }
 0x390   :  { %2060 = vrcp.f32 %v1142_v44  ;;  %v1154_v34 = vand.u32 2147483648, %v1142_v44  ;;  %v1152_v43 = vand.u32 2147483647, %v1142_v44  ;;  %v1133_v57 = vor.u32 1.1754944e-38, %v1132_v53  ;;  %1516 = vmatpush.msra.mxu1 %v3480_v41 }
 0x391   :  { %2062 = vrcp.f32 %v1166_v45  ;;  %vm1131_vm3 = vcmp.eq.f32.partialorder %v1130_v30, 8.507059e+37  ;;  %vm1148_vm4 = vweird.f32 %v1142_v44  ;;  %v1178_v20 = vand.u32 2147483648, %v1166_v45 }
 0x392   :  { %2064 = vtanh.f32 %v1158_v52  ;;  %v1155_v6 = vor.u32 1.1754944e-38, %v1154_v34  ;;  %vm1153_vm6 = vcmp.eq.f32.partialorder %v1152_v43, 8.507059e+37  ;;  %vm1172_vm8 = vweird.f32 %v1166_v45  ;;  %v3509_v52 = vld [vmem:[%s3883_s2 + $0x130] sm:$0xff] }
 0x393   :  { %v1176_v51 = vand.u32 2147483647, %v1166_v45  ;;  %v1179_v17 = vor.u32 1.1754944e-38, %v1178_v20  ;;  %v3611_v20 = vld [vmem:[%s3883_s2 + $0xb0] sm:$0xff] }
 0x394   :  { %v2059_v47 = vpop.eup %2058 }
 0x395   :  { %v1122_v48 = vmul.f32 %v2059_v47, %v1120_v37  ;;  %vm1127_vm12 = vweird.f32 %v2059_v47  ;;  %vm1177_vm10 = vcmp.eq.f32.partialorder %v1176_v51, 8.507059e+37  ;;  %v3468_v37 = vld [vmem:[%s3883_s2 + $0x178] sm:$0xff] }
 0x396   :  { %v2061_v50 = vpop.eup %2060  ;;  %vm1128_vm15 = vmor %vm1126_vm13, %vm1127_vm12  ;;  %1555 = vmatpush.msra.mxu3 %v3468_v37  ;;  %v3616_v51 = vld [vmem:[%s3883_s2 + $0xb8] sm:$0xff] }
 0x397   :  { %v2063_v54 = vpop.eup %2062  ;;  %v1123_v55 = vsub.f32 1.0, %v1122_v48  ;;  %v1144_v59 = vmul.f32 %v2061_v50, %v1142_v44  ;;  %vm1149_vm14 = vweird.f32 %v2061_v50  ;;  %v3485_v44 = vld [vmem:[%s3883_s2 + $0x150] sm:$0xff]  ;;  %v3502_v48 = vld [vmem:[%s3883_s2 + $0x128] sm:$0xff] }
 0x398   :  { %v1168_v60 = vmul.f32 %v2063_v54, %v1166_v45  ;;  %vm1150_vm5 = vmor %vm1148_vm4, %vm1149_vm14  ;;  %v2065_v3 = vpop.eup %2064  ;;  %vm1173_vm7 = vweird.f32 %v2063_v54  ;;  %v3492_v45 = vld [vmem:[%s3883_s2 + $0x158] sm:$0xff]  ;;  %1536 = vmatpush.msra.mxu2 %v3485_v44  ;;  %1517 = vmatpush.msra.mxu1 %v3502_v48 }
 0x399   :  { %v1145_v62 = vsub.f32 1.0, %v1144_v59  ;;  %v1124_v29 = vmul.f32 %v2059_v47, %v1123_v55  ;;  %vm1174_vm9 = vmor %vm1172_vm8, %vm1173_vm7  ;;  %1556 = vmatpush.msra.mxu3 %v3492_v45  ;;  %v3519_v55 = vld [vmem:[%s3883_s2 + $0x100] sm:$0xff] }
 0x39a   :  { %v1169_v58 = vsub.f32 1.0, %v1168_v60  ;;  %v3526_v60 = vld [vmem:[%s3883_s2 + $0x108] sm:$0xff]  ;;  %1537 = vmatpush.msra.mxu2 %v3509_v52 }
 0x39b   :  { %v1125_v39 = vadd.f32 %v2059_v47, %v1124_v29  ;;  %v1146_v42 = vmul.f32 %v2061_v50, %v1145_v62  ;;  %v3531_v62 = vld [vmem:[%s3883_s2 + $0x110] sm:$0xff]  ;;  %v3536_v29 = vld [vmem:[%s3883_s2 + $0x118] sm:$0xff]  ;;  %1518 = vmatpush.msra.mxu1 %v3526_v60 }
 0x39c   :  { %v1170_v8 = vmul.f32 %v2063_v54, %v1169_v58  ;;  %v3558_v58 = vld [vmem:[%s3883_s2 + $0xf0] sm:$0xff]  ;;  %1538 = vmatpush.msra.mxu2 %v3531_v62 }
 0x39d   :  { %v1129_v25 = vsel %vm1128_vm15, %v2059_v47, %v1125_v39  ;;  %v1147_v1 = vadd.f32 %v2061_v50, %v1146_v42  ;;  %v3497_v47 = vld [vmem:[%s3883_s2 + $0x120] sm:$0xff]  ;;  %v3548_v42 = vld [vmem:[%s3883_s2 + $0xe8] sm:$0xff] }
 0x39e   :  { %v1134_v56 = vsel %vm1131_vm3, %v1133_v57, %v1129_v25  ;;  %v1171_v13 = vadd.f32 %v2063_v54, %v1170_v8  ;;  %1497 = vmatpush.msra.mxu0 %v3497_v47  ;;  %v3543_v39 = vld [vmem:[%s3883_s2 + $0xe0] sm:$0xff]  ;;  %v1967_v57 = vld [vmem:[%s3881_s0 + $0x28] sm:$0xff]  ;;  %v3563_v25 = vld [vmem:[%s3883_s2 + $0xf8] sm:$0xff]  ;;  %1519 = vmatpush.msra.mxu1 %v3548_v42 }
 0x39f   :  { %v1151_v11 = vsel %vm1150_vm5, %v2061_v50, %v1147_v1  ;;  %v1183_v14 = vmul.f32 %v2065_v3, %v1134_v56  ;;  %v3590_v8 = vld [vmem:[%s3883_s2 + $0xd8] sm:$0xff]  ;;  %1539 = vmatpush.msra.mxu2 %v3558_v58 }
 0x3a0   :  { %v1156_v49 = vsel %vm1153_vm6, %v1155_v6, %v1151_v11  ;;  %v1175_v35 = vsel %vm1174_vm9, %v2063_v54, %v1171_v13  ;;  %v3514_v54 = vld [vmem:[%s3883_s2 + $0x138] sm:$0xff]  ;;  %1498 = vmatpush.msra.mxu0 %v3519_v55  ;;  %v3572_v6 = vld [vmem:[%s3883_s2 + $0xc0] sm:$0xff]  ;;  %v3577_v11 = vld [vmem:[%s3883_s2 + $0xc8] sm:$0xff] }
 0x3a1   :  { %v1182_v9 = vmul.f32 %v1156_v49, %v3333_v46  ;;  %v1180_v63 = vsel %vm1177_vm10, %v1179_v17, %v1175_v35  ;;  %v1966_v46 = vld [vmem:[%s3882_s1 + $0x8] sm:$0x3]  ;;  %1557 = vmatpush.msra.mxu3 %v3514_v54  ;;  %v3585_v49 = vld [vmem:[%s3883_s2 + $0xd0] sm:$0xff]  ;;  %1520 = vmatpush.msra.mxu1 %v3577_v11 }
 0x3a2   :  { %1499 = vmatpush.msra.mxu0 %v3543_v39  ;;  %v3604_v13 = vld [vmem:[%s3883_s2 + $0xa8] sm:$0xff]  ;;  %1540 = vmatpush.msra.mxu2 %v3585_v49 }
 0x3a3   :  { %v3346_v15 = vadd.f32 %v1183_v14, %v1182_v9  ;;  %1558 = vmatpush.msra.mxu3 %v3536_v29  ;;  %v3599_v14 = vld [vmem:[%s3883_s2 + $0xa0] sm:$0xff]  ;;  %1521 = vmatpush.msra.mxu1 %v3604_v13 }
 0x3a4   :  { %1500 = vmatpush.msra.mxu0 %v3572_v6  ;;  %1541 = vmatpush.msra.mxu2 %v3611_v20 }
 0x3a5   :  { %2066 = vtanh.f32 %v3346_v15  ;;  %1559 = vmatpush.msra.mxu3 %v3563_v25 }
 0x3a6   :  { %1501 = vmatpush.msra.mxu0 %v3599_v14 }
 0x3a7   :  { %1560 = vmatpush.msra.mxu3 %v3590_v8 }
 0x3a9   :  { %1561 = vmatpush.msra.mxu3 %v3616_v51 }
 0x3ab   :  { %v2067_v5 = vpop.eup %2066 }
 0x3ac   :  { %v1186_v4 = vmul.f32 %v2067_v5, %v1180_v63  ;;  %v3626_v63 = vld [vmem:[%s3883_s2 + $0x80] sm:$0xff] }
 0x3ad   :  { %1502 = vmatpush.msra.mxu0 %v3626_v63 }
 0x3ae   :  { %v1189_v0 = vadd.f32 %v1966_v46, %v1186_v4  ;;  %1274 = vmatmul.f32.vlgmr.msrb.gmra.mxu0 %v1186_v4  ;;  %1294 = vmatmul.f32.vlgmr.msrb.gmra.mxu1 %v1186_v4  ;;  %v3631_v46 = vld [vmem:[%s3883_s2 + $0x88] sm:$0xff] }
 0x3af   :  { %1314 = vmatmul.f32.vlgmr.msrb.gmra.mxu2 %v1186_v4  ;;  %1334 = vmatmul.f32.vlgmr.msrb.gmra.mxu3 %v1186_v4  ;;  %v3638_v4 = vld [vmem:[%s3883_s2 + $0x90] sm:$0xff] }
 0x3b0   :  { %1191 = vst [vmem:[#allocation4 + $0x8] sm:$0x3] %v1189_v0  ;;  %v3643_v0 = vld [vmem:[%s3883_s2 + $0x98] sm:$0xff]  ;;  %1522 = vmatpush.msra.mxu1 %v3631_v46  ;;  %1542 = vmatpush.msra.mxu2 %v3638_v4 }
 0x3b1   :  { %1562 = vmatpush.msra.mxu3 %v3643_v0 }
 0x42b   :  { %v1295_v36 = vpop.f32.mrf.mxu1  ;;  %v1275_v43 = vpop.f32.mrf.mxu0 }
 0x42c   :  { %v1342_v50 = vrot.slane %v1295_v36, 6 }
 0x42e   :  { %v1345_v1 = vsel %vm179_vm0, %v1275_v43, %v1342_v50  ;;  %v3674_v43 = vld [vmem:[%s3883_s2 + $0x40] sm:$0xff] }
 0x42f   :  { %3963 = vst [vmem:[#allocation24_spill] sm:$0xff] %v3674_v43 }
 0x432   :  { %v1315_v59 = vpop.f32.mrf.mxu2  ;;  %v1335_v53 = vpop.f32.mrf.mxu3 }
 0x433   :  { %v1343_v30 = vrot.slane %v1315_v59, 4  ;;  %v1344_v34 = vrot.slane %v1335_v53, 2  ;;  %v3650_v59 = vld [vmem:[%s3883_s2 + $0x60] sm:$0xff]  ;;  %v3655_v53 = vld [vmem:[%s3883_s2 + $0x68] sm:$0xff] }
 0x434   :  { %1503 = vmatpush.msra.mxu0 %v3650_v59  ;;  %1523 = vmatpush.msra.mxu1 %v3655_v53 }
 0x435   :  { %v1346_v56 = vsel %vm181_vm1, %v1343_v30, %v1344_v34  ;;  %v3662_v30 = vld [vmem:[%s3883_s2 + $0x70] sm:$0xff]  ;;  %v3667_v34 = vld [vmem:[%s3883_s2 + $0x78] sm:$0xff] }
 0x436   :  { %v1347_v3 = vsel %vm183_vm2, %v1345_v1, %v1346_v56  ;;  %3962 = vst [vmem:[#allocation23_spill] sm:$0xff] %v3667_v34  ;;  %v3686_v1 = vld [vmem:[%s3883_s2 + $0x50] sm:$0xff]  ;;  %v3691_v56 = vld [vmem:[%s3883_s2 + $0x58] sm:$0xff]  ;;  %1543 = vmatpush.msra.mxu2 %v3662_v30  ;;  %1563 = vmatpush.msra.mxu3 %v3667_v34 }
 0x437   :  { %v3592_v9 = vadd.f32 %v1967_v57, %v1347_v3  ;;  %v3679_v57 = vld [vmem:[%s3883_s2 + $0x48] sm:$0xff]  ;;  %3965 = vst [vmem:[#allocation26_spill] sm:$0xff] %v3686_v1  ;;  %v3698_v3 = vld [vmem:[%s3883_s2 + $0x20] sm:$0xff]  ;;  %1504 = vmatpush.msra.mxu0 %v3674_v43 }
 0x438   :  { %3964 = vst [vmem:[#allocation25_spill] sm:$0xff] %v3679_v57  ;;  %1524 = vmatpush.msra.mxu1 %v3679_v57  ;;  %1544 = vmatpush.msra.mxu2 %v3686_v1  ;;  %v3727_v57 = vld [vmem:[%s3883_s2 + $0x8] sm:$0xff]  ;;  %v3741_v1 = vld [vmem:[%s3883_s2 + $0x18] sm:$0xff] }
 0x439   :  { %v1968_v35 = vmul.f32 -1.442695, %v3592_v9  ;;  %v1370_v17 = vrot.slane %v3592_v9, 2  ;;  %v1394_v5 = vrot.slane %v3592_v9, 6  ;;  %3966 = vst [vmem:[#allocation27_spill] sm:$0xff] %v3691_v56  ;;  %1564 = vmatpush.msra.mxu3 %v3691_v56  ;;  %1505 = vmatpush.msra.mxu0 %v3698_v3  ;;  %v3736_v56 = vld [vmem:[%s3883_s2 + $0x10] sm:$0xff] }
 0x43a   :  { %3967 = vst [vmem:[#allocation28_spill] sm:$0xff] %v3698_v3 }
 0x43b   :  { %2068 = vpow2.f32 %v1968_v35  ;;  %v1969_v36 = vmul.f32 -1.442695, %v1370_v17  ;;  %v1970_v50 = vmul.f32 -1.442695, %v1394_v5  ;;  %v3703_v35 = vld [vmem:[%s3883_s2 + $0x28] sm:$0xff]  ;;  %v3710_v17 = vld [vmem:[%s3883_s2 + $0x30] sm:$0xff] }
 0x43c   :  { %3968 = vst [vmem:[#allocation29_spill] sm:$0xff] %v3703_v35  ;;  %v3715_v5 = vld [vmem:[%s3883_s2 + $0x38] sm:$0xff]  ;;  %1525 = vmatpush.msra.mxu1 %v3703_v35  ;;  %1545 = vmatpush.msra.mxu2 %v3710_v17 }
 0x43d   :  { %2070 = vpow2.f32 %v1969_v36  ;;  %1565 = vmatpush.msra.mxu3 %v3715_v5 }
 0x43e   :  { %2072 = vpow2.f32 %v1970_v50  ;;  %v3722_v50 = vld [vmem:[%s3883_s2] sm:$0xff]  ;;  %1526 = vmatpush.msra.mxu1 %v3727_v57  ;;  %1546 = vmatpush.msra.mxu2 %v3736_v56 }
 0x43f   :  { %1506 = vmatpush.msra.mxu0 %v3722_v50  ;;  %1566 = vmatpush.msra.mxu3 %v3741_v1 }
 0x440   :  { %1744 = vmatpush.msrb.mxu1 %v3360_v2  ;;  %1764 = vmatpush.msrb.mxu2 %v3365_v38  ;;  %v1391_v38 = vrot.slane %v3592_v9, 4 }
 0x441   :  { %v2069_v36 = vpop.eup %2068  ;;  %1724 = vmatpush.msrb.mxu0 %v3355_v61  ;;  %1784 = vmatpush.msrb.mxu3 %v3372_v7 }
 0x442   :  { %v3729_v43 = vadd.f32 1.0, %v2069_v36  ;;  %1745 = vmatpush.msrb.mxu1 %v3384_v12  ;;  %1765 = vmatpush.msrb.mxu2 %v3389_v16 }
 0x443   :  { %v2071_v34 = vpop.eup %2070  ;;  %1725 = vmatpush.msrb.mxu0 %v3379_v10  ;;  %1785 = vmatpush.msrb.mxu3 %v3396_v18 }
 0x444   :  { %v2073_v36 = vpop.eup %2072  ;;  %2074 = vrcp.f32 %v3729_v43  ;;  %v3746_v3 = vadd.f32 1.0, %v2071_v34  ;;  %1746 = vmatpush.msrb.mxu1 %v3408_v21  ;;  %1766 = vmatpush.msrb.mxu2 %v3413_v22  ;;  %v1365_v16 = vand.u32 2147483648, %v3729_v43  ;;  %v1363_v22 = vand.u32 2147483647, %v3729_v43 }
 0x445   :  { %v3750_v35 = vadd.f32 1.0, %v2073_v36  ;;  %1726 = vmatpush.msrb.mxu0 %v3403_v19  ;;  %1786 = vmatpush.msrb.mxu3 %v3420_v23  ;;  %vm1359_vm12 = vweird.f32 %v3729_v43 }
 0x446   :  { %2076 = vrcp.f32 %v3746_v3  ;;  %1747 = vmatpush.msrb.mxu1 %v3432_v26  ;;  %1767 = vmatpush.msrb.mxu2 %v3437_v27  ;;  %v1387_v23 = vand.u32 2147483648, %v3746_v3  ;;  %v1385_v27 = vand.u32 2147483647, %v3746_v3  ;;  %vm1364_vm15 = vcmp.eq.f32.partialorder %v1363_v22, 8.507059e+37 }
 0x447   :  { %2078 = vrcp.f32 %v3750_v35  ;;  %1727 = vmatpush.msrb.mxu0 %v3427_v24  ;;  %1787 = vmatpush.msrb.mxu3 %v3444_v28  ;;  %v1366_v28 = vor.u32 1.1754944e-38, %v1365_v16  ;;  %vm1381_vm3 = vweird.f32 %v3746_v3  ;;  %vm1405_vm7 = vweird.f32 %v3750_v35 }
 0x448   :  { %1748 = vmatpush.msrb.mxu1 %v3456_v32  ;;  %1768 = vmatpush.msrb.mxu2 %v3461_v33  ;;  %2080 = vtanh.f32 %v1391_v38  ;;  %vm1386_vm5 = vcmp.eq.f32.partialorder %v1385_v27, 8.507059e+37 }
 0x449   :  { %1728 = vmatpush.msrb.mxu0 %v3451_v31  ;;  %1788 = vmatpush.msrb.mxu3 %v3468_v37 }
 0x44a   :  { %v2075_v34 = vpop.eup %2074  ;;  %1749 = vmatpush.msrb.mxu1 %v3480_v41  ;;  %1769 = vmatpush.msrb.mxu2 %v3485_v44 }
 0x44b   :  { %v1355_v61 = vmul.f32 %v2075_v34, %v3729_v43  ;;  %vm1360_vm11 = vweird.f32 %v2075_v34  ;;  %1729 = vmatpush.msrb.mxu0 %v3475_v40  ;;  %1789 = vmatpush.msrb.mxu3 %v3492_v45  ;;  %v1388_v40 = vor.u32 1.1754944e-38, %v1387_v23 }
 0x44c   :  { %v2077_v2 = vpop.eup %2076  ;;  %vm1361_vm14 = vmor %vm1359_vm12, %vm1360_vm11  ;;  %1750 = vmatpush.msrb.mxu1 %v3502_v48  ;;  %1770 = vmatpush.msrb.mxu2 %v3509_v52 }
 0x44d   :  { %v3772_v7 = vpop.eup %2078  ;;  %v1356_v10 = vsub.f32 1.0, %v1355_v61  ;;  %v1377_v12 = vmul.f32 %v2077_v2, %v3746_v3  ;;  %vm1382_vm13 = vweird.f32 %v2077_v2  ;;  %1730 = vmatpush.msrb.mxu0 %v3497_v47  ;;  %1790 = vmatpush.msrb.mxu3 %v3514_v54 }
 0x44e   :  { %v1401_v18 = vmul.f32 %v3772_v7, %v3750_v35  ;;  %vm1383_vm4 = vmor %vm1381_vm3, %vm1382_vm13  ;;  %1751 = vmatpush.msrb.mxu1 %v3526_v60  ;;  %1771 = vmatpush.msrb.mxu2 %v3531_v62  ;;  %v2081_v44 = vpop.eup %2080  ;;  %vm1406_vm6 = vweird.f32 %v3772_v7  ;;  %v1409_v60 = vand.u32 2147483647, %v3750_v35 }
 0x44f   :  { %v1378_v19 = vsub.f32 1.0, %v1377_v12  ;;  %v1357_v21 = vmul.f32 %v2075_v34, %v1356_v10  ;;  %1731 = vmatpush.msrb.mxu0 %v3519_v55  ;;  %1791 = vmatpush.msrb.mxu3 %v3536_v29  ;;  %vm1407_vm8 = vmor %vm1405_vm7, %vm1406_vm6 }
 0x450   :  { %v1402_v31 = vsub.f32 1.0, %v1401_v18  ;;  %1752 = vmatpush.msrb.mxu1 %v3548_v42  ;;  %1772 = vmatpush.msrb.mxu2 %v3558_v58  ;;  %vm1410_vm9 = vcmp.eq.f32.partialorder %v1409_v60, 8.507059e+37  ;;  %v3970_v42 = vld [vmem:[#allocation24_spill] sm:$0xff]  ;;  %v3971_v58 = vld [vmem:[#allocation25_spill] sm:$0xff] }
 0x451   :  { %v1358_v24 = vadd.f32 %v2075_v34, %v1357_v21  ;;  %v1379_v26 = vmul.f32 %v2077_v2, %v1378_v19  ;;  %1732 = vmatpush.msrb.mxu0 %v3543_v39  ;;  %1792 = vmatpush.msrb.mxu3 %v3563_v25  ;;  %v3969_v39 = vld [vmem:[#allocation23_spill] sm:$0xff] }
 0x452   :  { %v1403_v47 = vmul.f32 %v3772_v7, %v1402_v31  ;;  %1753 = vmatpush.msrb.mxu1 %v3577_v11  ;;  %1773 = vmatpush.msrb.mxu2 %v3585_v49  ;;  %v1971_v11 = vld [vmem:[%s3882_s1 + $0xa] sm:$0x3]  ;;  %v3972_v49 = vld [vmem:[#allocation26_spill] sm:$0xff] }
 0x453   :  { %v1362_v32 = vsel %vm1361_vm14, %v2075_v34, %v1358_v24  ;;  %v1380_v33 = vadd.f32 %v2077_v2, %v1379_v26  ;;  %1733 = vmatpush.msrb.mxu0 %v3572_v6  ;;  %1793 = vmatpush.msrb.mxu3 %v3590_v8  ;;  %v3973_v8 = vld [vmem:[#allocation27_spill] sm:$0xff] }
 0x454   :  { %v1367_v37 = vsel %vm1364_vm15, %v1366_v28, %v1362_v32  ;;  %v1404_v55 = vadd.f32 %v3772_v7, %v1403_v47  ;;  %1754 = vmatpush.msrb.mxu1 %v3604_v13  ;;  %1774 = vmatpush.msrb.mxu2 %v3611_v20  ;;  %v3975_v13 = vld [vmem:[#allocation29_spill] sm:$0xff] }
 0x455   :  { %v1384_v41 = vsel %vm1383_vm4, %v2077_v2, %v1380_v33  ;;  %v1416_v52 = vmul.f32 %v2081_v44, %v1367_v37  ;;  %1734 = vmatpush.msrb.mxu0 %v3599_v14  ;;  %1794 = vmatpush.msrb.mxu3 %v3616_v51  ;;  %v3974_v14 = vld [vmem:[#allocation28_spill] sm:$0xff] }
 0x456   :  { %v1389_v45 = vsel %vm1386_vm5, %v1388_v40, %v1384_v41  ;;  %1755 = vmatpush.msrb.mxu1 %v3631_v46  ;;  %1775 = vmatpush.msrb.mxu2 %v3638_v4  ;;  %v1408_v62 = vsel %vm1407_vm8, %v3772_v7, %v1404_v55 }
 0x457   :  { %v1415_v48 = vmul.f32 %v1389_v45, %v3346_v15  ;;  %v1411_v15 = vand.u32 2147483648, %v3750_v35  ;;  %1735 = vmatpush.msrb.mxu0 %v3626_v63  ;;  %1795 = vmatpush.msrb.mxu3 %v3643_v0 }
 0x458   :  { %1756 = vmatpush.msrb.mxu1 %v3655_v53  ;;  %1776 = vmatpush.msrb.mxu2 %v3662_v30  ;;  %v1972_v30 = vld [vmem:[%s3881_s0 + $0x30] sm:$0xff] }
 0x459   :  { %v3811_v54 = vadd.f32 %v1416_v52, %v1415_v48  ;;  %1736 = vmatpush.msrb.mxu0 %v3650_v59  ;;  %v1412_v29 = vor.u32 1.1754944e-38, %v1411_v15  ;;  %1796 = vmatpush.msrb.mxu3 %v3969_v39 }
 0x45a   :  { %1757 = vmatpush.msrb.mxu1 %v3971_v58  ;;  %1777 = vmatpush.msrb.mxu2 %v3972_v49 }
 0x45b   :  { %2082 = vtanh.f32 %v3811_v54  ;;  %1737 = vmatpush.msrb.mxu0 %v3970_v42  ;;  %v1413_v6 = vsel %vm1410_vm9, %v1412_v29, %v1408_v62  ;;  %1797 = vmatpush.msrb.mxu3 %v3973_v8 }
 0x45c   :  { %1758 = vmatpush.msrb.mxu1 %v3975_v13  ;;  %1778 = vmatpush.msrb.mxu2 %v3710_v17 }
 0x45d   :  { %1738 = vmatpush.msrb.mxu0 %v3974_v14  ;;  %1798 = vmatpush.msrb.mxu3 %v3715_v5 }
 0x45e   :  { %1759 = vmatpush.msrb.mxu1 %v3727_v57  ;;  %1779 = vmatpush.msrb.mxu2 %v3736_v56 }
 0x45f   :  { %1739 = vmatpush.msrb.mxu0 %v3722_v50  ;;  %1799 = vmatpush.msrb.mxu3 %v3741_v1 }
 0x461   :  { %v2083_v25 = vpop.eup %2082 }
 0x462   :  { %v1419_v9 = vmul.f32 %v2083_v25, %v1413_v6 }
 0x464   :  { %v1422_v20 = vadd.f32 %v1971_v11, %v1419_v9  ;;  %1507 = vmatmul.f32.vlgmr.msra.gmra.mxu0 %v1419_v9  ;;  %1527 = vmatmul.f32.vlgmr.msra.gmra.mxu1 %v1419_v9 }
 0x465   :  { %1547 = vmatmul.f32.vlgmr.msra.gmra.mxu2 %v1419_v9  ;;  %1567 = vmatmul.f32.vlgmr.msra.gmra.mxu3 %v1419_v9 }
 0x466   :  { %1424 = vst [vmem:[#allocation4 + $0xa] sm:$0x3] %v1422_v20 }
 0x4e1   :  { %v1528_v51 = vpop.f32.mrf.mxu1  ;;  %v1508_v53 = vpop.f32.mrf.mxu0 }
 0x4e2   :  { %v1575_v63 = vrot.slane %v1528_v51, 6 }
 0x4e4   :  { %v1578_v43 = vsel %vm179_vm0, %v1508_v53, %v1575_v63 }
 0x4e8   :  { %v1548_v46 = vpop.f32.mrf.mxu2  ;;  %v1568_v4 = vpop.f32.mrf.mxu3 }
 0x4e9   :  { %v1576_v0 = vrot.slane %v1548_v46, 4  ;;  %v1577_v59 = vrot.slane %v1568_v4, 2 }
 0x4eb   :  { %v1579_v3 = vsel %vm181_vm1, %v1576_v0, %v1577_v59  ;;  %v1977_v59 = vld [vmem:[%s3881_s0 + $0x38] sm:$0xff]  ;;  %s2193_s0 = smov [#allocation6]  }
 0x4ec   :  { %v1580_v57 = vsel %vm183_vm2, %v1578_v43, %v1579_v3  ;;  %s1913_s6 = sshll.u32 %s2193_s0, 4  ;;  %s1914_s6 = int_to_ptr.vmem [resolvable:$true] %s1913_s6 }
 0x4ed   :  { %v1582_v56 = vadd.f32 %v1972_v30, %v1580_v57 }
 0x4ef   :  { %v1973_v35 = vmul.f32 -1.442695, %v1582_v56  ;;  %v1603_v1 = vrot.slane %v1582_v56, 2  ;;  %v1627_v17 = vrot.slane %v1582_v56, 6  ;;  %v1624_v18 = vrot.slane %v1582_v56, 4 }
 0x4f1   :  { %2084 = vpow2.f32 %v1973_v35  ;;  %v1974_v5 = vmul.f32 -1.442695, %v1603_v1  ;;  %v1975_v50 = vmul.f32 -1.442695, %v1627_v17 }
 0x4f3   :  { %2086 = vpow2.f32 %v1974_v5 }
 0x4f4   :  { %2088 = vpow2.f32 %v1975_v50 }
 0x4f7   :  { %v2085_v36 = vpop.eup %2084 }
 0x4f8   :  { %v1586_v34 = vadd.f32 1.0, %v2085_v36 }
 0x4f9   :  { %v2087_v61 = vpop.eup %2086 }
 0x4fa   :  { %v2089_v2 = vpop.eup %2088  ;;  %2090 = vrcp.f32 %v1586_v34  ;;  %v1608_v38 = vadd.f32 1.0, %v2087_v61  ;;  %v1598_v23 = vand.u32 2147483648, %v1586_v34  ;;  %v1596_v28 = vand.u32 2147483647, %v1586_v34 }
 0x4fb   :  { %v1632_v7 = vadd.f32 1.0, %v2089_v2  ;;  %vm1592_vm11 = vweird.f32 %v1586_v34 }
 0x4fc   :  { %2092 = vrcp.f32 %v1608_v38  ;;  %v1620_v31 = vand.u32 2147483648, %v1608_v38  ;;  %v1618_v37 = vand.u32 2147483647, %v1608_v38  ;;  %v1599_v40 = vor.u32 1.1754944e-38, %v1598_v23 }
 0x4fd   :  { %2094 = vrcp.f32 %v1632_v7  ;;  %vm1597_vm14 = vcmp.eq.f32.partialorder %v1596_v28, 8.507059e+37  ;;  %vm1614_vm15 = vweird.f32 %v1608_v38  ;;  %v1644_v58 = vand.u32 2147483648, %v1632_v7 }
 0x4fe   :  { %2096 = vtanh.f32 %v1624_v18  ;;  %v1621_v48 = vor.u32 1.1754944e-38, %v1620_v31  ;;  %vm1619_vm4 = vcmp.eq.f32.partialorder %v1618_v37, 8.507059e+37  ;;  %vm1638_vm6 = vweird.f32 %v1632_v7 }
 0x4ff   :  { %v1642_v25 = vand.u32 2147483647, %v1632_v7  ;;  %v1645_v11 = vor.u32 1.1754944e-38, %v1644_v58 }
 0x500   :  { %v2091_v10 = vpop.eup %2090 }
 0x501   :  { %v1588_v12 = vmul.f32 %v2091_v10, %v1586_v34  ;;  %vm1593_vm10 = vweird.f32 %v2091_v10  ;;  %vm1643_vm8 = vcmp.eq.f32.partialorder %v1642_v25, 8.507059e+37 }
 0x502   :  { %v2093_v16 = vpop.eup %2092  ;;  %vm1594_vm13 = vmor %vm1592_vm11, %vm1593_vm10 }
 0x503   :  { %v2095_v19 = vpop.eup %2094  ;;  %v1589_v21 = vsub.f32 1.0, %v1588_v12  ;;  %v1610_v22 = vmul.f32 %v2093_v16, %v1608_v38  ;;  %vm1615_vm12 = vweird.f32 %v2093_v16 }
 0x504   :  { %v1634_v24 = vmul.f32 %v2095_v19, %v1632_v7  ;;  %vm1616_vm3 = vmor %vm1614_vm15, %vm1615_vm12  ;;  %v2097_v55 = vpop.eup %2096  ;;  %vm1639_vm5 = vweird.f32 %v2095_v19 }
 0x505   :  { %v1611_v26 = vsub.f32 1.0, %v1610_v22  ;;  %v1590_v27 = vmul.f32 %v2091_v10, %v1589_v21  ;;  %vm1640_vm7 = vmor %vm1638_vm6, %vm1639_vm5 }
 0x506   :  { %v1635_v41 = vsub.f32 1.0, %v1634_v24 }
 0x507   :  { %v1591_v32 = vadd.f32 %v2091_v10, %v1590_v27  ;;  %v1612_v33 = vmul.f32 %v2093_v16, %v1611_v26 }
 0x508   :  { %v1636_v60 = vmul.f32 %v2095_v19, %v1635_v41 }
 0x509   :  { %v1595_v44 = vsel %vm1594_vm13, %v2091_v10, %v1591_v32  ;;  %v1613_v45 = vadd.f32 %v2093_v16, %v1612_v33 }
 0x50a   :  { %v1600_v47 = vsel %vm1597_vm14, %v1599_v40, %v1595_v44  ;;  %v1637_v42 = vadd.f32 %v2095_v19, %v1636_v60 }
 0x50b   :  { %v1617_v52 = vsel %vm1616_vm3, %v2093_v16, %v1613_v45  ;;  %v1649_v29 = vmul.f32 %v2097_v55, %v1600_v47 }
 0x50c   :  { %v1622_v15 = vsel %vm1619_vm4, %v1621_v48, %v1617_v52  ;;  %v1641_v6 = vsel %vm1640_vm7, %v2095_v19, %v1637_v42 }
 0x50d   :  { %v1648_v62 = vmul.f32 %v1622_v15, %v3811_v54  ;;  %v1646_v8 = vsel %vm1643_vm8, %v1645_v11, %v1641_v6  ;;  %v1976_v54 = vld [vmem:[%s3882_s1 + $0xc] sm:$0x3] }
 0x50f   :  { %v3856_v39 = vadd.f32 %v1649_v29, %v1648_v62 }
 0x511   :  { %2098 = vtanh.f32 %v3856_v39 }
 0x517   :  { %v2099_v49 = vpop.eup %2098 }
 0x518   :  { %v1652_v9 = vmul.f32 %v2099_v49, %v1646_v8  ;;  %v1981_v49 = vld [vmem:[%s3882_s1 + $0xe] sm:$0x3]  ;;  %s2197_s1 = smov 2  }
 0x51a   :  { %v1655_v14 = vadd.f32 %v1976_v54, %v1652_v9  ;;  %1740 = vmatmul.f32.vlgmr.msrb.gmra.mxu0 %v1652_v9  ;;  %1760 = vmatmul.f32.vlgmr.msrb.gmra.mxu1 %v1652_v9 }
 0x51b   :  { %1780 = vmatmul.f32.vlgmr.msrb.gmra.mxu2 %v1652_v9  ;;  %1800 = vmatmul.f32.vlgmr.msrb.gmra.mxu3 %v1652_v9 }
 0x51c   :  { %1657 = vst [vmem:[#allocation4 + $0xc] sm:$0x3] %v1655_v14 }
 0x597   :  { %v1761_v13 = vpop.f32.mrf.mxu1  ;;  %v1741_v0 = vpop.f32.mrf.mxu0 }
 0x598   :  { %v1808_v20 = vrot.slane %v1761_v13, 6 }
 0x59a   :  { %v1811_v53 = vsel %vm179_vm0, %v1741_v0, %v1808_v20 }
 0x59e   :  { %v1781_v51 = vpop.f32.mrf.mxu2  ;;  %v1801_v63 = vpop.f32.mrf.mxu3 }
 0x59f   :  { %v1809_v46 = vrot.slane %v1781_v51, 4  ;;  %v1810_v4 = vrot.slane %v1801_v63, 2 }
 0x5a1   :  { %v1812_v30 = vsel %vm181_vm1, %v1809_v46, %v1810_v4 }
 0x5a2   :  { %v1813_v43 = vsel %vm183_vm2, %v1811_v53, %v1812_v30 }
 0x5a3   :  { %v1815_v3 = vadd.f32 %v1977_v59, %v1813_v43 }
 0x5a5   :  { %v1978_v57 = vmul.f32 -1.442695, %v1815_v3  ;;  %v1836_v56 = vrot.slane %v1815_v3, 2  ;;  %v1860_v35 = vrot.slane %v1815_v3, 6  ;;  %v1857_v12 = vrot.slane %v1815_v3, 4 }
 0x5a7   :  { %2100 = vpow2.f32 %v1978_v57  ;;  %v1979_v1 = vmul.f32 -1.442695, %v1836_v56  ;;  %v1980_v17 = vmul.f32 -1.442695, %v1860_v35 }
 0x5a9   :  { %2102 = vpow2.f32 %v1979_v1 }
 0x5aa   :  { %2104 = vpow2.f32 %v1980_v17 }
 0x5ad   :  { %v2101_v5 = vpop.eup %2100 }
 0x5ae   :  { %v1819_v50 = vadd.f32 1.0, %v2101_v5 }
 0x5af   :  { %v2103_v36 = vpop.eup %2102 }
 0x5b0   :  { %v2105_v34 = vpop.eup %2104  ;;  %2106 = vrcp.f32 %v1819_v50  ;;  %v1841_v61 = vadd.f32 1.0, %v2103_v36  ;;  %v1831_v21 = vand.u32 2147483648, %v1819_v50  ;;  %v1829_v26 = vand.u32 2147483647, %v1819_v50 }
 0x5b1   :  { %v1865_v2 = vadd.f32 1.0, %v2105_v34  ;;  %vm1825_vm1 = vweird.f32 %v1819_v50 }
 0x5b2   :  { %2108 = vrcp.f32 %v1841_v61  ;;  %v1853_v27 = vand.u32 2147483648, %v1841_v61  ;;  %v1851_v32 = vand.u32 2147483647, %v1841_v61  ;;  %v1832_v33 = vor.u32 1.1754944e-38, %v1831_v21 }
 0x5b3   :  { %2110 = vrcp.f32 %v1865_v2  ;;  %vm1830_vm10 = vcmp.eq.f32.partialorder %v1829_v26, 8.507059e+37  ;;  %vm1847_vm11 = vweird.f32 %v1841_v61  ;;  %v1877_v42 = vand.u32 2147483648, %v1865_v2 }
 0x5b4   :  { %2112 = vtanh.f32 %v1857_v12  ;;  %v1854_v45 = vor.u32 1.1754944e-38, %v1853_v27  ;;  %vm1852_vm13 = vcmp.eq.f32.partialorder %v1851_v32, 8.507059e+37  ;;  %vm1871_vm15 = vweird.f32 %v1865_v2 }
 0x5b5   :  { %v1875_v58 = vand.u32 2147483647, %v1865_v2  ;;  %v1878_v6 = vor.u32 1.1754944e-38, %v1877_v42 }
 0x5b6   :  { %v2107_v38 = vpop.eup %2106 }
 0x5b7   :  { %v1821_v7 = vmul.f32 %v2107_v38, %v1819_v50  ;;  %vm1826_vm0 = vweird.f32 %v2107_v38  ;;  %vm1876_vm4 = vcmp.eq.f32.partialorder %v1875_v58, 8.507059e+37 }
 0x5b8   :  { %v2109_v10 = vpop.eup %2108  ;;  %vm1827_vm9 = vmor %vm1825_vm1, %vm1826_vm0 }
 0x5b9   :  { %v2111_v16 = vpop.eup %2110  ;;  %v1822_v18 = vsub.f32 1.0, %v1821_v7  ;;  %v1843_v19 = vmul.f32 %v2109_v10, %v1841_v61  ;;  %vm1848_vm2 = vweird.f32 %v2109_v10 }
 0x5ba   :  { %v1867_v22 = vmul.f32 %v2111_v16, %v1865_v2  ;;  %vm1849_vm12 = vmor %vm1847_vm11, %vm1848_vm2  ;;  %v2113_v48 = vpop.eup %2112  ;;  %vm1872_vm14 = vweird.f32 %v2111_v16 }
 0x5bb   :  { %v1844_v23 = vsub.f32 1.0, %v1843_v19  ;;  %v1823_v24 = vmul.f32 %v2107_v38, %v1822_v18  ;;  %vm1873_vm3 = vmor %vm1871_vm15, %vm1872_vm14 }
 0x5bc   :  { %v1868_v37 = vsub.f32 1.0, %v1867_v22 }
 0x5bd   :  { %v1824_v28 = vadd.f32 %v2107_v38, %v1823_v24  ;;  %v1845_v31 = vmul.f32 %v2109_v10, %v1844_v23 }
 0x5be   :  { %v1869_v55 = vmul.f32 %v2111_v16, %v1868_v37 }
 0x5bf   :  { %v1828_v40 = vsel %vm1827_vm9, %v2107_v38, %v1824_v28  ;;  %v1846_v41 = vadd.f32 %v2109_v10, %v1845_v31 }
 0x5c0   :  { %v1833_v44 = vsel %vm1830_vm10, %v1832_v33, %v1828_v40  ;;  %v1870_v29 = vadd.f32 %v2111_v16, %v1869_v55 }
 0x5c1   :  { %v1850_v47 = vsel %vm1849_vm12, %v2109_v10, %v1846_v41  ;;  %v1882_v60 = vmul.f32 %v2113_v48, %v1833_v44 }
 0x5c2   :  { %v1855_v52 = vsel %vm1852_vm13, %v1854_v45, %v1850_v47  ;;  %v1874_v25 = vsel %vm1873_vm3, %v2111_v16, %v1870_v29 }
 0x5c3   :  { %v1881_v15 = vmul.f32 %v1855_v52, %v3856_v39  ;;  %v1879_v11 = vsel %vm1876_vm4, %v1878_v6, %v1874_v25 }
 0x5c5   :  { %v1883_v62 = vadd.f32 %v1882_v60, %v1881_v15 }
 0x5c7   :  { %2114 = vtanh.f32 %v1883_v62  ;;  %1892 = vst [vmem:[#allocation3] sm:$0x3] %v1883_v62 }
 0x5c8   :  { %1894 = vst [vmem:[#allocation8] sm:$0x3] %v1883_v62 }
 0x5cd   :  { %v2115_v39 = vpop.eup %2114 }
 0x5ce   :  { %v1885_v8 = vmul.f32 %v2115_v39, %v1879_v11 }
 0x5d0   :  { %v1888_v54 = vadd.f32 %v1981_v49, %v1885_v8  ;;  %1891 = vst [vmem:[#allocation2] sm:$0x3] %v1885_v8 }
 0x5d1   :  { %1893 = vst [vmem:[#allocation6] sm:$0x3] %v1885_v8 }
 0x5d2   :  { %1890 = vst [vmem:[#allocation4 + $0xe] sm:$0x3] %v1888_v54  ;;  %1918 = dma.vmem_to_hbm [thread:$0]  %s1914_s6, 32, %s1916_s9, [#allocation7]  }
 0x5d3   :  { %1907 = dma.vmem_to_hbm [thread:$0]  %s1900_s11, 256, %s1902_s14, [#allocation5], %s2196_s3, %s2196_s3, %s2197_s1  }
 0x5d4   :  { %1929 = dma.vmem_to_hbm [thread:$0]  %s1925_s18, 32, %s1927_s20, [#allocation7]  }
 0x5d5   :  { %2188 = dma.done.wait [#allocation5], 256  }
 0x5d6   :  { %2189 = vsyncadd [#allocation5], 4294967040 }
 0x5d7   :  { %2190 = dma.done.wait [#allocation7], 64  }
 0x5d8   :  { %2191 = vsyncadd [#allocation7], 4294967232 }
 0x5d9   :  { %1942 = vsyncpa [#allocation5], 1 }
 0x5da   :  { %1943 = vsyncpa [#allocation7], 1 }

</bundles_post_ra>
